<compile_context>
chip_gen: v7x
topology: tpu7x:2x2x1
jax: 0.10.0
libtpu: 0.0.40
codegen_flags: <defaults>
</compile_context>

<pallas_src>
import functools
import math

import jax
import jax.numpy as jnp
from jax import lax
from jax.experimental import pallas as pl
from jax.experimental.pallas import tpu as pltpu

LN_EPS = 1e-5
NEG_INF = -1e30
LANES = 128
MIB = 1024 * 1024


def _round_up(x, m):
    return (x + m - 1) // m * m


def _layer_norm(x, gamma, beta):
    mu = jnp.mean(x, axis=-1, keepdims=True)
    var = jnp.mean((x - mu) * (x - mu), axis=-1, keepdims=True)
    return (x - mu) * lax.rsqrt(var + LN_EPS) * gamma + beta


def _mosaic_params(est_bytes, semantics):
    # vmem_limit sized from the explicit buffer budget, clamped to [32 MiB, 128 MiB].
    limit = int(max(min(2 * est_bytes + 4 * MIB, 128 * MIB), 32 * MIB))
    return pltpu.CompilerParams(dimension_semantics=semantics,
                                vmem_limit_bytes=limit)


def _pick_vocab_tile(vp, max_tile=2048):
    """Largest multiple of 128 that divides the padded vocab and is <= max_tile."""
    best, k = LANES, LANES
    while k <= min(vp, max_tile):
        if vp % k == 0:
            best = k
        k += LANES
    return best


def _decoder_vmem_estimate(bt, s, d, h):
    n = bt * s
    w_layer = (3 * d * d + d * d + 4 * d * d + 4 * d * d) * 2 + 8 * d * 4
    blocks = (2 * w_layer            # double-buffered per-layer weights + vecs
              + 2 * 2 * d * 4        # out LN gamma/beta
              + 2 * n * d * 4        # x input block (double-buffered)
              + 2 * n * d * 2        # bf16 hidden output block
              + n * d * 4)           # resident activation scratch
    temps = (n * 3 * d * 4           # qkv
             + 3 * n * d * 2         # q/k/v bf16
             + 2 * bt * h * s * s * 4  # scores + p
             + bt * h * s * (d // h) * 4  # og
             + n * 4 * d * 4         # h1
             + 4 * n * d * 4)        # xn / a1 / a2 / ffn
    return blocks + temps


# --------------------------- fused decoder-stack kernel ---------------------------

def _decoder_kernel(x_ref, wqkv_ref, wo_ref, w1_ref, w2_ref, vecs_ref, out_ln_ref,
                    h_out_ref, x_sc,
                    *, n_heads, n_layers, batch_tile, seq_len, compute_dtype):
    layer = pl.program_id(1)
    cd = compute_dtype

    # bring the activation tile into the resident scratch at the first layer
    @pl.when(layer == 0)
    def _():
        x_sc[...] = x_ref[...]

    x = x_sc[...]                                   # (N, D) f32, N = batch_tile * S
    N, D = x.shape
    H, S, B = n_heads, seq_len, batch_tile
    hd = D // H

    vecs = vecs_ref[...]                            # (8, D) packed per-layer vectors
    ln1_g, ln1_b = vecs[0:1, :], vecs[1:2, :]
    ln2_g, ln2_b = vecs[2:3, :], vecs[3:4, :]
    b_q, b_k, b_v = vecs[4:5, :], vecs[5:6, :], vecs[6:7, :]   # b_q already scaled
    b_o = vecs[7:8, :]

    # ---- attention ----
    xn = _layer_norm(x, ln1_g, ln1_b)               # self_attn_norm (f32)

    # fused QKV projection: one full-D contraction on the MXU (bf16 in, f32 acc)
    qkv = jnp.dot(xn.astype(cd), wqkv_ref[...],
                  preferred_element_type=jnp.float32)            # (N, 3D)
    q = (qkv[:, 0:D] + b_q).astype(cd)              # 1/sqrt(hd) folded into wq/bq
    k = (qkv[:, D:2 * D] + b_k).astype(cd)
    v = (qkv[:, 2 * D:3 * D] + b_v).astype(cd)

    # single reshape + transpose per projection (no per-head lane slicing / concat)
    def split_heads(t):                             # (N, D) -> (B*H, S, hd)
        return t.reshape(B, S, H, hd).transpose(0, 2, 1, 3).reshape(B * H, S, hd)

    qg, kg, vg = split_heads(q), split_heads(k), split_heads(v)

    row = lax.broadcasted_iota(jnp.int32, (S, S), 0)
    col = lax.broadcasted_iota(jnp.int32, (S, S), 1)
    causal = (col > row)[None, :, :]                             # (1, S, S)

    scores = jnp.einsum('gqe,gke->gqk', qg, kg,
                        preferred_element_type=jnp.float32)      # (B*H, S, S) f32
    scores = jnp.where(causal, NEG_INF, scores)
    m = jnp.max(scores, axis=-1, keepdims=True)
    p = jnp.exp(scores - m)                                      # unnormalized
    l_sum = jnp.sum(p, axis=-1, keepdims=True)                   # (B*H, S, 1)
    og = jnp.einsum('gqk,gke->gqe', p.astype(cd), vg,
                    preferred_element_type=jnp.float32)          # (B*H, S, hd)
    # normalize on (S, hd) instead of the SxS matrix (much cheaper VPU pass)
    og = og * pl.reciprocal(l_sum, approx=True)

    # concat heads back to (N, D): one transpose + reshape, then one out-proj matmul
    o = og.reshape(B, H, S, hd).transpose(0, 2, 1, 3).reshape(N, D)
    attn = jnp.dot(o.astype(cd), wo_ref[...],
                   preferred_element_type=jnp.float32) + b_o

    a1 = xn + attn        # residual from the *normed* input (module quirk — intentional)

    # ---- FFN ----
    a2 = _layer_norm(a1, ln2_g, ln2_b)
    h1 = jnp.dot(a2.astype(cd), w1_ref[...],
                 preferred_element_type=jnp.float32)             # (N, 4D)
    h1 = jax.nn.gelu(h1, approximate=True)                       # tanh GELU -> EUP slot
    ffn = jnp.dot(h1.astype(cd), w2_ref[...],
                  preferred_element_type=jnp.float32)            # (N, D)
    x_new = a1 + ffn
    x_sc[...] = x_new

    # ---- final LayerNorm folded into the last layer step, stored as bf16 ----
    @pl.when(layer == n_layers - 1)
    def _():
        oln = out_ln_ref[...]
        xo = _layer_norm(x_new, oln[0:1, :], oln[1:2, :])
        h_out_ref[...] = xo.astype(h_out_ref.dtype)


# ------------------------------ logits (vocab-tiled) ------------------------------

def _logits_kernel(h_ref, w_ref, out_ref):
    out_ref[...] = jnp.dot(h_ref[...], w_ref[...],
                           preferred_element_type=jnp.float32)


# ------------------------------- wrapper / params --------------------------------

def init_params(key, num_layers, dim_model, num_tokens, seq_len):
    """PyTorch-layout parameters (as nn.MultiheadAttention / nn.Linear store them)."""
    D = dim_model
    keys = jax.random.split(key, 4 + num_layers)

    def nrm(k, shape, scale):
        return (scale * jax.random.normal(k, shape)).astype(jnp.float32)

    params = {
        'token_emb': nrm(keys[0], (num_tokens, D), 1.0),
        'pos_emb': nrm(keys[1], (seq_len, D), 1.0),
        'out_ln_g': jnp.ones((1, D), jnp.float32),
        'out_ln_b': jnp.zeros((1, D), jnp.float32),
        'w_out': nrm(keys[2], (num_tokens, D), 1.0 / math.sqrt(D)),
        'layers': [],
    }
    for li in range(num_layers):
        lk = jax.random.split(keys[4 + li], 6)
        params['layers'].append({
            'ln1_g': jnp.ones((1, D), jnp.float32),
            'ln1_b': jnp.zeros((1, D), jnp.float32),
            'w_in': nrm(lk[0], (3 * D, D), 1.0 / math.sqrt(D)),
            'b_in': nrm(lk[1], (1, 3 * D), 0.02),
            'w_o': nrm(lk[2], (D, D), 1.0 / math.sqrt(D)),
            'b_o': nrm(lk[3], (1, D), 0.02),
            'ln2_g': jnp.ones((1, D), jnp.float32),
            'ln2_b': jnp.zeros((1, D), jnp.float32),
            'w1': nrm(lk[4], (4 * D, D), 1.0 / math.sqrt(D)),
            'w2': nrm(lk[5], (D, 4 * D), 1.0 / math.sqrt(4 * D)),
        })
    return params


def prepare_params(params, n_heads, *, batch_tile=1, compute_dtype=jnp.bfloat16):
    """One-time repack: stack per-layer weights, pre-transpose to (in, out), fold the
    1/sqrt(hd) scale into Q, pack small vectors, pad the vocab dim to 128 lanes."""
    D = params['token_emb'].shape[1]
    V = params['w_out'].shape[0]
    hd = D // n_heads
    scale = 1.0 / math.sqrt(hd)

    w_qkv, w_o_t, w1_t, w2_t, vecs = [], [], [], [], []
    for lp in params['layers']:
        w_in = lp['w_in']                                       # (3D, D)
        wq, wk, wv = w_in[:D], w_in[D:2 * D], w_in[2 * D:]
        b_in = lp['b_in'].reshape(3 * D)
        bq, bk, bv = b_in[:D], b_in[D:2 * D], b_in[2 * D:]
        w_qkv.append(jnp.concatenate([wq.T * scale, wk.T, wv.T],
                                     axis=1).astype(compute_dtype))   # (D, 3D)
        w_o_t.append(lp['w_o'].T.astype(compute_dtype))         # (D, D)
        w1_t.append(lp['w1'].T.astype(compute_dtype))           # (D, 4D)
        w2_t.append(lp['w2'].T.astype(compute_dtype))           # (4D, D)
        vecs.append(jnp.stack([
            lp['ln1_g'].reshape(D), lp['ln1_b'].reshape(D),
            lp['ln2_g'].reshape(D), lp['ln2_b'].reshape(D),
            bq * scale, bk, bv, lp['b_o'].reshape(D)], axis=0)) # (8, D)

    Vp = _round_up(V, LANES)
    w_out_t = jnp.zeros((D, Vp), compute_dtype).at[:, :V].set(
        params['w_out'].T.astype(compute_dtype))

    return {
        'token_emb': params['token_emb'],
        'pos_emb': params['pos_emb'],
        'w_qkv': jnp.stack(w_qkv),                              # (L, D, 3D) bf16
        'w_o_t': jnp.stack(w_o_t),                              # (L, D, D)  bf16
        'w1_t': jnp.stack(w1_t),                                # (L, D, 4D) bf16
        'w2_t': jnp.stack(w2_t),                                # (L, 4D, D) bf16
        'vecs': jnp.stack(vecs).astype(jnp.float32),            # (L, 8, D)  f32
        'out_ln': jnp.stack([params['out_ln_g'].reshape(D),
                             params['out_ln_b'].reshape(D)], axis=0),  # (2, D)
        'w_out_t': w_out_t,                                     # (D, Vp)    bf16
        'n_layers': len(params['layers']),
        'n_heads': n_heads,
        'num_tokens': V,
        'batch_tile': batch_tile,
        'compute_dtype': compute_dtype,
    }


def transformer_forward(prep, inputs):
    B, S = inputs.shape
    D = prep['token_emb'].shape[1]
    L, H, V = prep['n_layers'], prep['n_heads'], prep['num_tokens']
    Vp = prep['w_out_t'].shape[1]
    Bt = prep['batch_tile']
    cd = prep['compute_dtype']
    assert B % Bt == 0, "batch must be divisible by batch_tile"
    N_t = Bt * S
    assert (B // Bt == 1) or (N_t % 8 == 0), "batch_tile*seq_len must be a multiple of 8"

    # embedding gather stays in plain JAX (table gather; dropout = identity in eval)
    x = jnp.take(prep['token_emb'], inputs, axis=0) + prep['pos_emb'][:S][None]
    x = x.reshape(B * S, D).astype(jnp.float32)

    # ---- stage 1: fused decoder stack (layer-streamed weights, resident activation) ----
    dec_kernel = functools.partial(
        _decoder_kernel, n_heads=H, n_layers=L, batch_tile=Bt, seq_len=S,
        compute_dtype=cd)

    hidden = pl.pallas_call(
        dec_kernel,
        out_shape=jax.ShapeDtypeStruct((B * S, D), cd),          # bf16 hidden (post out-LN)
        grid_spec=pltpu.PrefetchScalarGridSpec(
            num_scalar_prefetch=0,
            grid=(B // Bt, L),                                   # (batch tiles, layers)
            in_specs=[
                pl.BlockSpec((N_t, D), lambda b, l: (b, 0)),              # x
                pl.BlockSpec((None, D, 3 * D), lambda b, l: (l, 0, 0)),   # w_qkv
                pl.BlockSpec((None, D, D), lambda b, l: (l, 0, 0)),       # w_o^T
                pl.BlockSpec((None, D, 4 * D), lambda b, l: (l, 0, 0)),   # w1^T
                pl.BlockSpec((None, 4 * D, D), lambda b, l: (l, 0, 0)),   # w2^T
                pl.BlockSpec((None, 8, D), lambda b, l: (l, 0, 0)),       # packed vecs
                pl.BlockSpec((2, D), lambda b, l: (0, 0)),                # out LN g/b
            ],
            out_specs=pl.BlockSpec((N_t, D), lambda b, l: (b, 0)),
            scratch_shapes=[pltpu.VMEM((N_t, D), jnp.float32)],  # resident activation
        ),
        compiler_params=_mosaic_params(_decoder_vmem_estimate(Bt, S, D, H),
                                       ("parallel", "arbitrary")),
    )(x, prep['w_qkv'], prep['w_o_t'], prep['w1_t'], prep['w2_t'],
      prep['vecs'], prep['out_ln'])

    # ---- stage 2: logits projection, tiled over the padded (lane-dense) vocab ----
    tile_v = _pick_vocab_tile(Vp)
    rows_tile = N_t
    logit_vmem = (2 * rows_tile * D * 2 + 2 * D * tile_v * 2
                  + 2 * rows_tile * tile_v * 4)
    logits_p = pl.pallas_call(
        _logits_kernel,
        out_shape=jax.ShapeDtypeStruct((B * S, Vp), jnp.float32),
        grid_spec=pltpu.PrefetchScalarGridSpec(
            num_scalar_prefetch=0,
            grid=(B * S // rows_tile, Vp // tile_v),
            in_specs=[
                pl.BlockSpec((rows_tile, D), lambda i, j: (i, 0)),
                pl.BlockSpec((D, tile_v), lambda i, j: (0, j)),
            ],
            out_specs=pl.BlockSpec((rows_tile, tile_v), lambda i, j: (i, j)),
        ),
        compiler_params=_mosaic_params(logit_vmem, ("parallel", "parallel")),
    )(hidden, prep['w_out_t'])

    logits = logits_p[:, :V].reshape(B, S, V)
    return jnp.transpose(logits, (1, 0, 2))                      # (S, B, V) like PyTorch


# ------------------------------ pure-JAX reference -------------------------------

def _ref_forward(params, inputs, n_heads):
    D = params['token_emb'].shape[1]
    hd = D // n_heads
    B, S = inputs.shape
    x = jnp.take(params['token_emb'], inputs, axis=0) + params['pos_emb'][:S][None]

    def ln(v, g, b):
        mu = v.mean(-1, keepdims=True)
        var = ((v - mu) ** 2).mean(-1, keepdims=True)
        return (v - mu) / jnp.sqrt(var + LN_EPS) * g.reshape(1, 1, -1) + b.reshape(1, 1, -1)

    mask = jnp.triu(jnp.full((S, S), -jnp.inf), k=1)
    for lp in params['layers']:
        xn = ln(x, lp['ln1_g'], lp['ln1_b'])
        qkv = jnp.einsum('bsd,ed->bse', xn, lp['w_in']) + lp['b_in'].reshape(1, 1, -1)
        q, k, v = jnp.split(qkv, 3, axis=-1)
        q = q.reshape(B, S, n_heads, hd).transpose(0, 2, 1, 3) / math.sqrt(hd)
        k = k.reshape(B, S, n_heads, hd).transpose(0, 2, 1, 3)
        v = v.reshape(B, S, n_heads, hd).transpose(0, 2, 1, 3)
        scores = jnp.einsum('bhse,bhte->bhst', q, k) + mask[None, None]
        p = jax.nn.softmax(scores, axis=-1)
        o = jnp.einsum('bhst,bhte->bhse', p, v).transpose(0, 2, 1, 3).reshape(B, S, D)
        attn = jnp.einsum('bse,de->bsd', o, lp['w_o']) + lp['b_o'].reshape(1, 1, -1)
        a1 = xn + attn
        a2 = ln(a1, lp['ln2_g'], lp['ln2_b'])
        # NOTE: tanh GELU to match the kernel (PyTorch nn.GELU() default is exact erf)
        h = jax.nn.gelu(jnp.einsum('bsd,fd->bsf', a2, lp['w1']), approximate=True)
        x = a1 + jnp.einsum('bsf,df->bsd', h, lp['w2'])
    xn = ln(x, params['out_ln_g'], params['out_ln_b'])
    return jnp.einsum('bsd,vd->bsv', xn, params['w_out']).transpose(1, 0, 2)


# ------------------------------------- main ---------------------------------------

if __name__ == "__main__":
    num_layers, dim_model, num_heads, num_tokens, seq_len, batch = 2, 32, 4, 16, 8, 2

    key = jax.random.PRNGKey(0)
    pkey, ikey = jax.random.split(key)
    params = init_params(pkey, num_layers, dim_model, num_tokens, seq_len)
    inputs = jax.random.randint(ikey, (batch, seq_len), 0, num_tokens, dtype=jnp.int32)

    prep = prepare_params(params, num_heads, batch_tile=1)   # B//Bt = 2 (even, v7x-friendly)
    logits = transformer_forward(prep, inputs)
    logits = jax.block_until_ready(logits)

    assert logits.shape == (seq_len, batch, num_tokens)
    ref = _ref_forward(params, inputs, num_heads)
    # tolerance accounts for bf16 matmul operands + approx reciprocal in softmax
    max_err = float(jnp.max(jnp.abs(logits - ref)))
    assert max_err < 5e-2, f"mismatch vs JAX reference: max abs err {max_err}"
    print("KERNEL_OK")
</pallas_src>

<mosaic_0001>
module attributes {stable_mosaic.version = 11 : i64} {
  func.func @_decoder_kernel(%arg0: i32, %arg1: i32, %arg2: memref<8x32xf32, #tpu.memory_space<vmem>>, %arg3: memref<1x32x96xbf16, #tpu.memory_space<vmem>>, %arg4: memref<1x32x32xbf16, #tpu.memory_space<vmem>>, %arg5: memref<1x32x128xbf16, #tpu.memory_space<vmem>>, %arg6: memref<1x128x32xbf16, #tpu.memory_space<vmem>>, %arg7: memref<1x8x32xf32, #tpu.memory_space<vmem>>, %arg8: memref<2x32xf32, #tpu.memory_space<vmem>>, %arg9: memref<8x32xbf16, #tpu.memory_space<vmem>>, %arg10: memref<8x32xf32, #tpu.memory_space<vmem>>) attributes {dimension_semantics = [#tpu.dimension_semantics<parallel>, #tpu.dimension_semantics<arbitrary>], iteration_bounds = array<i64: 2, 2>, scalar_prefetch = 0 : i64, scratch_operands = 1 : i64, tpu.core_type = #tpu.core_type<tc>, window_params = [{transform_indices = @transform_0, window_bounds = array<i64: 8, 32>}, {transform_indices = @transform_1, window_bounds = array<i64: 1, 32, 96>}, {transform_indices = @transform_2, window_bounds = array<i64: 1, 32, 32>}, {transform_indices = @transform_3, window_bounds = array<i64: 1, 32, 128>}, {transform_indices = @transform_4, window_bounds = array<i64: 1, 128, 32>}, {transform_indices = @transform_5, window_bounds = array<i64: 1, 8, 32>}, {pipeline_mode = #tpu.pipeline_mode<synchronous>, transform_indices = @transform_6, window_bounds = array<i64: 2, 32>}, {transform_indices = @transform_7, window_bounds = array<i64: 8, 32>}]} {
    %c0_i32 = arith.constant 0 : i32
    %0 = arith.cmpi eq, %arg1, %c0_i32 : i32
    %1 = arith.extui %0 : i1 to i32
    %c0_i32_0 = arith.constant 0 : i32
    %2 = arith.cmpi ne, %1, %c0_i32_0 : i32
    scf.if %2 {
      %c0_42 = arith.constant 0 : index
      %c0_43 = arith.constant 0 : index
      %144 = vector.load %arg2[%c0_42, %c0_43] : memref<8x32xf32, #tpu.memory_space<vmem>>, vector<8x32xf32>
      %c0_44 = arith.constant 0 : index
      %c0_45 = arith.constant 0 : index
      %145 = vector.load %arg10[%c0_44, %c0_45] : memref<8x32xf32, #tpu.memory_space<vmem>>, vector<8x32xf32>
      tpu.vector_store %arg10[%c0_44, %c0_45], %144 {strides = array<i32>} : memref<8x32xf32, #tpu.memory_space<vmem>>, vector<8x32xf32>,
    } else {
    }
    %c0 = arith.constant 0 : index
    %c0_1 = arith.constant 0 : index
    %3 = vector.load %arg10[%c0, %c0_1] : memref<8x32xf32, #tpu.memory_space<vmem>>, vector<8x32xf32>
    %c0_2 = arith.constant 0 : index
    %c0_3 = arith.constant 0 : index
    %c0_4 = arith.constant 0 : index
    %4 = vector.load %arg7[%c0_2, %c0_3, %c0_4] : memref<1x8x32xf32, #tpu.memory_space<vmem>>, vector<1x8x32xf32>
    %5 = vector.shape_cast %4 : vector<1x8x32xf32> to vector<8x32xf32>
    %6 = vector.extract_strided_slice %5 {offsets = [0, 0], sizes = [1, 32], strides = [1, 1]} : vector<8x32xf32> to vector<1x32xf32>
    %7 = vector.extract_strided_slice %5 {offsets = [1, 0], sizes = [1, 32], strides = [1, 1]} : vector<8x32xf32> to vector<1x32xf32>
    %8 = vector.extract_strided_slice %5 {offsets = [2, 0], sizes = [1, 32], strides = [1, 1]} : vector<8x32xf32> to vector<1x32xf32>
    %9 = vector.extract_strided_slice %5 {offsets = [3, 0], sizes = [1, 32], strides = [1, 1]} : vector<8x32xf32> to vector<1x32xf32>
    %10 = vector.extract_strided_slice %5 {offsets = [4, 0], sizes = [1, 32], strides = [1, 1]} : vector<8x32xf32> to vector<1x32xf32>
    %11 = vector.extract_strided_slice %5 {offsets = [5, 0], sizes = [1, 32], strides = [1, 1]} : vector<8x32xf32> to vector<1x32xf32>
    %12 = vector.extract_strided_slice %5 {offsets = [6, 0], sizes = [1, 32], strides = [1, 1]} : vector<8x32xf32> to vector<1x32xf32>
    %13 = vector.extract_strided_slice %5 {offsets = [7, 0], sizes = [1, 32], strides = [1, 1]} : vector<8x32xf32> to vector<1x32xf32>
    %cst = arith.constant dense<0.000000e+00> : vector<8xf32>
    %14 = vector.multi_reduction <add>, %3, %cst [1] : vector<8x32xf32> to vector<8xf32>
    %15 = vector.shape_cast %14 : vector<8xf32> to vector<8x1xf32>
    %cst_5 = arith.constant 3.200000e+01 : f32
    %16 = vector.broadcast %cst_5 : f32 to vector<8x1xf32>
    %17 = arith.divf %15, %16 : vector<8x1xf32>
    %18 = vector.broadcast %17 : vector<8x1xf32> to vector<8x32xf32>
    %19 = arith.subf %3, %18 : vector<8x32xf32>
    %20 = vector.broadcast %17 : vector<8x1xf32> to vector<8x32xf32>
    %21 = arith.subf %3, %20 : vector<8x32xf32>
    %22 = arith.mulf %19, %21 : vector<8x32xf32>
    %cst_6 = arith.constant dense<0.000000e+00> : vector<8xf32>
    %23 = vector.multi_reduction <add>, %22, %cst_6 [1] : vector<8x32xf32> to vector<8xf32>
    %24 = vector.shape_cast %23 : vector<8xf32> to vector<8x1xf32>
    %cst_7 = arith.constant 3.200000e+01 : f32
    %25 = vector.broadcast %cst_7 : f32 to vector<8x1xf32>
    %26 = arith.divf %24, %25 : vector<8x1xf32>
    %27 = vector.broadcast %17 : vector<8x1xf32> to vector<8x32xf32>
    %28 = arith.subf %3, %27 : vector<8x32xf32>
    %cst_8 = arith.constant 9.99999974E-6 : f32
    %29 = vector.broadcast %cst_8 : f32 to vector<8x1xf32>
    %30 = arith.addf %26, %29 : vector<8x1xf32>
    %31 = math.rsqrt %30 : vector<8x1xf32>
    %32 = vector.broadcast %31 : vector<8x1xf32> to vector<8x32xf32>
    %33 = arith.mulf %28, %32 : vector<8x32xf32>
    %34 = vector.broadcast %6 : vector<1x32xf32> to vector<8x32xf32>
    %35 = arith.mulf %33, %34 : vector<8x32xf32>
    %36 = vector.broadcast %7 : vector<1x32xf32> to vector<8x32xf32>
    %37 = arith.addf %35, %36 : vector<8x32xf32>
    %38 = arith.truncf %37 : vector<8x32xf32> to vector<8x32xbf16>
    %c0_9 = arith.constant 0 : index
    %c0_10 = arith.constant 0 : index
    %c0_11 = arith.constant 0 : index
    %39 = vector.load %arg3[%c0_9, %c0_10, %c0_11] : memref<1x32x96xbf16, #tpu.memory_space<vmem>>, vector<1x32x96xbf16>
    %40 = vector.shape_cast %39 : vector<1x32x96xbf16> to vector<32x96xbf16>
    %cst_12 = arith.constant dense<0.000000e+00> : vector<8x96xf32>
    %41 = tpu.matmul %38, %40, %cst_12 {dimension_numbers = #tpu.dot_dimension_numbers<[1], [0], [0], [1], [0, 0, 1, 1], [], []>} : vector<8x32xbf16>, vector<32x96xbf16>, vector<8x96xf32> -> vector<8x96xf32>
    %42 = vector.extract_strided_slice %41 {offsets = [0, 0], sizes = [8, 32], strides = [1, 1]} : vector<8x96xf32> to vector<8x32xf32>
    %43 = vector.broadcast %10 : vector<1x32xf32> to vector<8x32xf32>
    %44 = arith.addf %42, %43 : vector<8x32xf32>
    %45 = arith.truncf %44 : vector<8x32xf32> to vector<8x32xbf16>
    %46 = vector.extract_strided_slice %41 {offsets = [0, 32], sizes = [8, 32], strides = [1, 1]} : vector<8x96xf32> to vector<8x32xf32>
    %47 = vector.broadcast %11 : vector<1x32xf32> to vector<8x32xf32>
    %48 = arith.addf %46, %47 : vector<8x32xf32>
    %49 = arith.truncf %48 : vector<8x32xf32> to vector<8x32xbf16>
    %50 = vector.extract_strided_slice %41 {offsets = [0, 64], sizes = [8, 32], strides = [1, 1]} : vector<8x96xf32> to vector<8x32xf32>
    %51 = vector.broadcast %12 : vector<1x32xf32> to vector<8x32xf32>
    %52 = arith.addf %50, %51 : vector<8x32xf32>
    %53 = arith.truncf %52 : vector<8x32xf32> to vector<8x32xbf16>
    %54 = vector.shape_cast %45 : vector<8x32xbf16> to vector<1x8x4x8xbf16>
    %55 = tpu.transpose %54, [0, 2, 1, 3] : vector<1x8x4x8xbf16> -> vector<1x4x8x8xbf16>
    %56 = vector.shape_cast %55 : vector<1x4x8x8xbf16> to vector<4x8x8xbf16>
    %57 = vector.shape_cast %49 : vector<8x32xbf16> to vector<1x8x4x8xbf16>
    %58 = tpu.transpose %57, [0, 2, 1, 3] : vector<1x8x4x8xbf16> -> vector<1x4x8x8xbf16>
    %59 = vector.shape_cast %58 : vector<1x4x8x8xbf16> to vector<4x8x8xbf16>
    %60 = vector.shape_cast %53 : vector<8x32xbf16> to vector<1x8x4x8xbf16>
    %61 = tpu.transpose %60, [0, 2, 1, 3] : vector<1x8x4x8xbf16> -> vector<1x4x8x8xbf16>
    %62 = vector.shape_cast %61 : vector<1x4x8x8xbf16> to vector<4x8x8xbf16>
    %63 = tpu.iota {dimensions = array<i32: 0>} : vector<8x8xi32>
    %64 = tpu.iota {dimensions = array<i32: 1>} : vector<8x8xi32>
    %65 = arith.cmpi sgt, %64, %63 : vector<8x8xi32>
    %66 = vector.shape_cast %65 : vector<8x8xi1> to vector<1x8x8xi1>
    "tpu.trace_start"() <{level = 10 : i32, message = "gqe,gke->gqk"}> : () -> ()
    %cst_13 = arith.constant dense<0.000000e+00> : vector<4x8x8xf32>
    %67 = tpu.matmul %56, %59, %cst_13 {dimension_numbers = #tpu.dot_dimension_numbers<[2], [2], [1], [1], [0, 0, 0, 1, 1, 1], [0], [0]>} : vector<4x8x8xbf16>, vector<4x8x8xbf16>, vector<4x8x8xf32> -> vector<4x8x8xf32>
    %cst_14 = arith.constant -1.000000e+30 : f32
    "tpu.trace_stop"() : () -> ()
    %68 = vector.shape_cast %66 : vector<1x8x8xi1> to vector<1x8x8xi1>
    %69 = vector.broadcast %68 : vector<1x8x8xi1> to vector<4x8x8xi1>
    %70 = vector.broadcast %cst_14 : f32 to vector<4x8x8xf32>
    %71 = arith.select %69, %70, %67 : vector<4x8x8xi1>, vector<4x8x8xf32>
    %cst_15 = arith.constant dense<0xFF800000> : vector<4x8xf32>
    %72 = vector.multi_reduction <maximumf>, %71, %cst_15 [2] : vector<4x8x8xf32> to vector<4x8xf32>
    %73 = vector.shape_cast %72 : vector<4x8xf32> to vector<4x8x1xf32>
    %74 = vector.broadcast %73 : vector<4x8x1xf32> to vector<4x8x8xf32>
    %75 = arith.subf %71, %74 : vector<4x8x8xf32>
    %76 = math.exp %75 : vector<4x8x8xf32>
    %cst_16 = arith.constant dense<0.000000e+00> : vector<4x8xf32>
    %77 = vector.multi_reduction <add>, %76, %cst_16 [2] : vector<4x8x8xf32> to vector<4x8xf32>
    %78 = vector.shape_cast %77 : vector<4x8xf32> to vector<4x8x1xf32>
    %79 = arith.truncf %76 : vector<4x8x8xf32> to vector<4x8x8xbf16>
    "tpu.trace_start"() <{level = 10 : i32, message = "gqk,gke->gqe"}> : () -> ()
    %cst_17 = arith.constant dense<0.000000e+00> : vector<4x8x8xf32>
    %80 = tpu.matmul %79, %62, %cst_17 {dimension_numbers = #tpu.dot_dimension_numbers<[2], [1], [1], [2], [0, 0, 0, 1, 1, 2], [0], [0]>} : vector<4x8x8xbf16>, vector<4x8x8xbf16>, vector<4x8x8xf32> -> vector<4x8x8xf32>
    "tpu.trace_stop"() : () -> ()
    %81 = tpu.reciprocal %78 {approx = true} : vector<4x8x1xf32> -> vector<4x8x1xf32>
    %82 = vector.broadcast %81 : vector<4x8x1xf32> to vector<4x8x8xf32>
    %83 = arith.mulf %80, %82 : vector<4x8x8xf32>
    %84 = vector.shape_cast %83 : vector<4x8x8xf32> to vector<1x4x8x8xf32>
    %85 = tpu.transpose %84, [0, 2, 1, 3] : vector<1x4x8x8xf32> -> vector<1x8x4x8xf32>
    %86 = vector.shape_cast %85 : vector<1x8x4x8xf32> to vector<8x32xf32>
    %87 = arith.truncf %86 : vector<8x32xf32> to vector<8x32xbf16>
    %c0_18 = arith.constant 0 : index
    %c0_19 = arith.constant 0 : index
    %c0_20 = arith.constant 0 : index
    %88 = vector.load %arg4[%c0_18, %c0_19, %c0_20] : memref<1x32x32xbf16, #tpu.memory_space<vmem>>, vector<1x32x32xbf16>
    %89 = vector.shape_cast %88 : vector<1x32x32xbf16> to vector<32x32xbf16>
    %cst_21 = arith.constant dense<0.000000e+00> : vector<8x32xf32>
    %90 = tpu.matmul %87, %89, %cst_21 {dimension_numbers = #tpu.dot_dimension_numbers<[1], [0], [0], [1], [0, 0, 1, 1], [], []>} : vector<8x32xbf16>, vector<32x32xbf16>, vector<8x32xf32> -> vector<8x32xf32>
    %91 = vector.broadcast %13 : vector<1x32xf32> to vector<8x32xf32>
    %92 = arith.addf %90, %91 : vector<8x32xf32>
    %93 = arith.addf %37, %92 : vector<8x32xf32>
    %cst_22 = arith.constant dense<0.000000e+00> : vector<8xf32>
    %94 = vector.multi_reduction <add>, %93, %cst_22 [1] : vector<8x32xf32> to vector<8xf32>
    %95 = vector.shape_cast %94 : vector<8xf32> to vector<8x1xf32>
    %cst_23 = arith.constant 3.200000e+01 : f32
    %96 = vector.broadcast %cst_23 : f32 to vector<8x1xf32>
    %97 = arith.divf %95, %96 : vector<8x1xf32>
    %98 = vector.broadcast %97 : vector<8x1xf32> to vector<8x32xf32>
    %99 = arith.subf %93, %98 : vector<8x32xf32>
    %100 = vector.broadcast %97 : vector<8x1xf32> to vector<8x32xf32>
    %101 = arith.subf %93, %100 : vector<8x32xf32>
    %102 = arith.mulf %99, %101 : vector<8x32xf32>
    %cst_24 = arith.constant dense<0.000000e+00> : vector<8xf32>
    %103 = vector.multi_reduction <add>, %102, %cst_24 [1] : vector<8x32xf32> to vector<8xf32>
    %104 = vector.shape_cast %103 : vector<8xf32> to vector<8x1xf32>
    %cst_25 = arith.constant 3.200000e+01 : f32
    %105 = vector.broadcast %cst_25 : f32 to vector<8x1xf32>
    %106 = arith.divf %104, %105 : vector<8x1xf32>
    %107 = vector.broadcast %97 : vector<8x1xf32> to vector<8x32xf32>
    %108 = arith.subf %93, %107 : vector<8x32xf32>
    %cst_26 = arith.constant 9.99999974E-6 : f32
    %109 = vector.broadcast %cst_26 : f32 to vector<8x1xf32>
    %110 = arith.addf %106, %109 : vector<8x1xf32>
    %111 = math.rsqrt %110 : vector<8x1xf32>
    %112 = vector.broadcast %111 : vector<8x1xf32> to vector<8x32xf32>
    %113 = arith.mulf %108, %112 : vector<8x32xf32>
    %114 = vector.broadcast %8 : vector<1x32xf32> to vector<8x32xf32>
    %115 = arith.mulf %113, %114 : vector<8x32xf32>
    %116 = vector.broadcast %9 : vector<1x32xf32> to vector<8x32xf32>
    %117 = arith.addf %115, %116 : vector<8x32xf32>
    %118 = arith.truncf %117 : vector<8x32xf32> to vector<8x32xbf16>
    %c0_27 = arith.constant 0 : index
    %c0_28 = arith.constant 0 : index
    %c0_29 = arith.constant 0 : index
    %119 = vector.load %arg5[%c0_27, %c0_28, %c0_29] : memref<1x32x128xbf16, #tpu.memory_space<vmem>>, vector<1x32x128xbf16>
    %120 = vector.shape_cast %119 : vector<1x32x128xbf16> to vector<32x128xbf16>
    %cst_30 = arith.constant dense<0.000000e+00> : vector<8x128xf32>
    %121 = tpu.matmul %118, %120, %cst_30 {dimension_numbers = #tpu.dot_dimension_numbers<[1], [0], [0], [1], [0, 0, 1, 1], [], []>} : vector<8x32xbf16>, vector<32x128xbf16>, vector<8x128xf32> -> vector<8x128xf32>
    %122 = arith.mulf %121, %121 : vector<8x128xf32>
    %123 = arith.mulf %121, %122 : vector<8x128xf32>
    %cst_31 = arith.constant 4.471500e-02 : f32
    %124 = vector.broadcast %cst_31 : f32 to vector<8x128xf32>
    %125 = arith.mulf %124, %123 : vector<8x128xf32>
    %126 = arith.addf %121, %125 : vector<8x128xf32>
    %cst_32 = arith.constant 0.797884583 : f32
    %127 = vector.broadcast %cst_32 : f32 to vector<8x128xf32>
    %128 = arith.mulf %127, %126 : vector<8x128xf32>
    %129 = math.tanh %128 : vector<8x128xf32>
    %cst_33 = arith.constant 1.000000e+00 : f32
    %130 = vector.broadcast %cst_33 : f32 to vector<8x128xf32>
    %131 = arith.addf %130, %129 : vector<8x128xf32>
    %cst_34 = arith.constant 5.000000e-01 : f32
    %132 = vector.broadcast %cst_34 : f32 to vector<8x128xf32>
    %133 = arith.mulf %132, %131 : vector<8x128xf32>
    %134 = arith.mulf %121, %133 : vector<8x128xf32>
    %135 = arith.truncf %134 : vector<8x128xf32> to vector<8x128xbf16>
    %c0_35 = arith.constant 0 : index
    %c0_36 = arith.constant 0 : index
    %c0_37 = arith.constant 0 : index
    %136 = vector.load %arg6[%c0_35, %c0_36, %c0_37] : memref<1x128x32xbf16, #tpu.memory_space<vmem>>, vector<1x128x32xbf16>
    %137 = vector.shape_cast %136 : vector<1x128x32xbf16> to vector<128x32xbf16>
    %cst_38 = arith.constant dense<0.000000e+00> : vector<8x32xf32>
    %138 = tpu.matmul %135, %137, %cst_38 {dimension_numbers = #tpu.dot_dimension_numbers<[1], [0], [0], [1], [0, 0, 1, 1], [], []>} : vector<8x128xbf16>, vector<128x32xbf16>, vector<8x32xf32> -> vector<8x32xf32>
    %139 = arith.addf %93, %138 : vector<8x32xf32>
    %c0_39 = arith.constant 0 : index
    %c0_40 = arith.constant 0 : index
    %140 = vector.load %arg10[%c0_39, %c0_40] : memref<8x32xf32, #tpu.memory_space<vmem>>, vector<8x32xf32>
    tpu.vector_store %arg10[%c0_39, %c0_40], %139 {strides = array<i32>} : memref<8x32xf32, #tpu.memory_space<vmem>>, vector<8x32xf32>,
    %c1_i32 = arith.constant 1 : i32
    %141 = arith.cmpi eq, %arg1, %c1_i32 : i32
    %142 = arith.extui %141 : i1 to i32
    %c0_i32_41 = arith.constant 0 : i32
    %143 = arith.cmpi ne, %142, %c0_i32_41 : i32
    scf.if %143 {
      %c0_42 = arith.constant 0 : index
      %c0_43 = arith.constant 0 : index
      %144 = vector.load %arg8[%c0_42, %c0_43] : memref<2x32xf32, #tpu.memory_space<vmem>>, vector<2x32xf32>
      %145 = vector.extract_strided_slice %144 {offsets = [0, 0], sizes = [1, 32], strides = [1, 1]} : vector<2x32xf32> to vector<1x32xf32>
      %146 = vector.extract_strided_slice %144 {offsets = [1, 0], sizes = [1, 32], strides = [1, 1]} : vector<2x32xf32> to vector<1x32xf32>
      %cst_44 = arith.constant dense<0.000000e+00> : vector<8xf32>
      %147 = vector.multi_reduction <add>, %139, %cst_44 [1] : vector<8x32xf32> to vector<8xf32>
      %148 = vector.shape_cast %147 : vector<8xf32> to vector<8x1xf32>
      %cst_45 = arith.constant 3.200000e+01 : f32
      %149 = vector.broadcast %cst_45 : f32 to vector<8x1xf32>
      %150 = arith.divf %148, %149 : vector<8x1xf32>
      %151 = vector.broadcast %150 : vector<8x1xf32> to vector<8x32xf32>
      %152 = arith.subf %139, %151 : vector<8x32xf32>
      %153 = vector.broadcast %150 : vector<8x1xf32> to vector<8x32xf32>
      %154 = arith.subf %139, %153 : vector<8x32xf32>
      %155 = arith.mulf %152, %154 : vector<8x32xf32>
      %cst_46 = arith.constant dense<0.000000e+00> : vector<8xf32>
      %156 = vector.multi_reduction <add>, %155, %cst_46 [1] : vector<8x32xf32> to vector<8xf32>
      %157 = vector.shape_cast %156 : vector<8xf32> to vector<8x1xf32>
      %cst_47 = arith.constant 3.200000e+01 : f32
      %158 = vector.broadcast %cst_47 : f32 to vector<8x1xf32>
      %159 = arith.divf %157, %158 : vector<8x1xf32>
      %160 = vector.broadcast %150 : vector<8x1xf32> to vector<8x32xf32>
      %161 = arith.subf %139, %160 : vector<8x32xf32>
      %cst_48 = arith.constant 9.99999974E-6 : f32
      %162 = vector.broadcast %cst_48 : f32 to vector<8x1xf32>
      %163 = arith.addf %159, %162 : vector<8x1xf32>
      %164 = math.rsqrt %163 : vector<8x1xf32>
      %165 = vector.broadcast %164 : vector<8x1xf32> to vector<8x32xf32>
      %166 = arith.mulf %161, %165 : vector<8x32xf32>
      %167 = vector.broadcast %145 : vector<1x32xf32> to vector<8x32xf32>
      %168 = arith.mulf %166, %167 : vector<8x32xf32>
      %169 = vector.broadcast %146 : vector<1x32xf32> to vector<8x32xf32>
      %170 = arith.addf %168, %169 : vector<8x32xf32>
      %171 = arith.truncf %170 : vector<8x32xf32> to vector<8x32xbf16>
      %c0_49 = arith.constant 0 : index
      %c0_50 = arith.constant 0 : index
      %172 = vector.load %arg9[%c0_49, %c0_50] : memref<8x32xbf16, #tpu.memory_space<vmem>>, vector<8x32xbf16>
      tpu.vector_store %arg9[%c0_49, %c0_50], %171 {strides = array<i32>} : memref<8x32xbf16, #tpu.memory_space<vmem>>, vector<8x32xbf16>,
    } else {
    }
    return
  }
  func.func @transform_0(%arg0: i32, %arg1: i32) -> (i32, i32) {
    %c0_i32 = arith.constant 0 : i32
    %c0_i32_0 = arith.constant 0 : i32
    return %arg0, %c0_i32 : i32, i32
  }
  func.func @transform_1(%arg0: i32, %arg1: i32) -> (i32, i32, i32) {
    %c0_i32 = arith.constant 0 : i32
    %c0_i32_0 = arith.constant 0 : i32
    %c0_i32_1 = arith.constant 0 : i32
    return %arg1, %c0_i32, %c0_i32_0 : i32, i32, i32
  }
  func.func @transform_2(%arg0: i32, %arg1: i32) -> (i32, i32, i32) {
    %c0_i32 = arith.constant 0 : i32
    %c0_i32_0 = arith.constant 0 : i32
    %c0_i32_1 = arith.constant 0 : i32
    return %arg1, %c0_i32, %c0_i32_0 : i32, i32, i32
  }
  func.func @transform_3(%arg0: i32, %arg1: i32) -> (i32, i32, i32) {
    %c0_i32 = arith.constant 0 : i32
    %c0_i32_0 = arith.constant 0 : i32
    %c0_i32_1 = arith.constant 0 : i32
    return %arg1, %c0_i32, %c0_i32_0 : i32, i32, i32
  }
  func.func @transform_4(%arg0: i32, %arg1: i32) -> (i32, i32, i32) {
    %c0_i32 = arith.constant 0 : i32
    %c0_i32_0 = arith.constant 0 : i32
    %c0_i32_1 = arith.constant 0 : i32
    return %arg1, %c0_i32, %c0_i32_0 : i32, i32, i32
  }
  func.func @transform_5(%arg0: i32, %arg1: i32) -> (i32, i32, i32) {
    %c0_i32 = arith.constant 0 : i32
    %c0_i32_0 = arith.constant 0 : i32
    %c0_i32_1 = arith.constant 0 : i32
    return %arg1, %c0_i32, %c0_i32_0 : i32, i32, i32
  }
  func.func @transform_6(%arg0: i32, %arg1: i32) -> (i32, i32) {
    %c0_i32 = arith.constant 0 : i32
    %c0_i32_0 = arith.constant 0 : i32
    %c0_i32_1 = arith.constant 0 : i32
    return %c0_i32, %c0_i32_0 : i32, i32
  }
  func.func @transform_7(%arg0: i32, %arg1: i32) -> (i32, i32) {
    %c0_i32 = arith.constant 0 : i32
    %c0_i32_0 = arith.constant 0 : i32
    return %arg0, %c0_i32 : i32, i32
  }
}

</mosaic_0001>

<bundles_post_ra>
// kernel: tpu_custom_call.1
= control target key start
LH: loop header
LB: loop body
LE: loop exit
PB: predicated region body
PF: predicated region fallthrough
CT: control target
= control target key end

     0   :  { %12 = vsyncpa [#allocation4], 0  ;;  %s2910_s0 = inlined_call_operand.vmem [shape: f32[16,32], index: 0, kind: input, shape index: {}]   ;;  %s2911_s1 = inlined_call_operand.vmem [shape: bf16[2,32,96], index: 1, kind: input, shape index: {}]   ;;  %s2912_s2 = inlined_call_operand.vmem [shape: bf16[2,32,32], index: 2, kind: input, shape index: {}]   ;;  %s2913_s3 = inlined_call_operand.vmem [shape: bf16[2,32,128], index: 3, kind: input, shape index: {}]   ;;  %s2914_s4 = inlined_call_operand.vmem [shape: bf16[2,128,32], index: 4, kind: input, shape index: {}]   ;;  %s2915_s5 = inlined_call_operand.vmem [shape: f32[2,8,32], index: 5, kind: input, shape index: {}]   ;;  %s2916_s6 = inlined_call_operand.vmem [shape: f32[2,32], index: 6, kind: input, shape index: {}]   ;;  %s2917_s7 = inlined_call_operand.hbm [shape: bf16[16,32], index: 7, kind: output, shape index: {}]  }
   0x1   :  { %14 = vsyncpa [#allocation4 + $0x1], 0  ;;  %s2500_s24 = smov 0   ;;  %s2502_s25 = smov 0  }
   0x2   :  { %s2504_s26 = smov 0   ;;  %s2506_s27 = smov 0  }
   0x3   :  { %s2508_s28 = smov 0   ;;  %s2510_s29 = smov 0  }
   0x4   :  { %s2512_s30 = smov 0   ;;  %s2514_s8 = smov 0  }
   0x5 LB: > { %2927 = sst [smem:[#allocation6_spill]] %s2415_s24  ;;  %s2047_s9 = sadd.s32 4294967295, %s2443_s8   ;;  %s2443_s8 = sphi %s2514_s8, %s20_s8   ;;  %s2439_s30 = sphi %s2512_s30, %s2947_s30   ;;  %s2435_s29 = sphi %s2510_s29, %s2946_s29   ;;  %s2431_s28 = sphi %s2508_s28, %s2945_s28   ;;  %s2427_s27 = sphi %s2506_s27, %s2944_s27   ;;  %s2423_s26 = sphi %s2504_s26, %s2943_s26   ;;  %s2419_s25 = sphi %s2502_s25, %s2949_s25   ;;  %s2415_s24 = sphi %s2500_s24, %s2948_s24  }
   0x6   : > { %2928 = sst [smem:[#allocation7_spill]] %s2423_s26  ;;  %s2048_s10 = sadd.s32 4294967294, %s2443_s8  }
   0x7   : > { %2929 = sst [smem:[#allocation8_spill]] %s2435_s29  ;;  %s29_s11 = sadd.s32 1, %s2435_s29 }
   0x8   : > { %2930 = sst [smem:[#allocation9_spill]] %s2439_s30  ;;  %p30_p0 = scmp.ge.s32.totalorder %s29_s11, 2 }
   0x9   : > { %2931 = sst [smem:[#allocation10_spill]] %s2443_s8  ;;  %s32_s12 = sadd.s32 1, %s2439_s30 }
   0xa   : > { %p226_p1 = scmp.ne.s32.totalorder %s2423_s26, %s2419_s25  ;;  %p227_p2 = scmp.eq.s32.totalorder %s2047_s9, 3 }
   0xb   : > { %s2951_s11 = smov (%p30_p0, %s29_s11), 0  ;;  %s2953_s12 = smov (!%p30_p0, %s32_s12), %s2439_s30 }
   0xc   : > { %2932 = sst [smem:[#allocation11_spill]] %s2951_s11  ;;  %p2549_p3 = por %p227_p2, %p226_p1 }
   0xd   : > { %p232_p4 = scmp.ne.s32.totalorder %s2419_s25, %s2415_s24  ;;  %p34_p5 = scmp.ge.s32.totalorder %s2953_s12, 2 }
   0xe   : > { %p233_p6 = scmp.eq.s32.totalorder %s2048_s10, 3  ;;  %p2051_p7 = scmp.ge.s32.totalorder %s2443_s8, 1 }
   0xf   : > { %p300_p8 = scmp.lt.s32.totalorder %s2443_s8, 5  ;;  %s2955_s12 = smov (%p34_p5, %s2953_s12), 0 }
  0x10   : > { %2934 = sst [smem:[#allocation12_spill]] %s2955_s12  ;;  %p2559_p9 = por %p233_p6, %p232_p4 }
  0x11   : > { %p301_p10 = pnand %p2051_p7, %p300_p8  ;;  %s213_s15 = ssub.s32 %s2439_s30, %s2955_s12 }
  0x12   : > { %s2935_s14 = scalar_select %p2559_p9, 1, 0 }
  0x13   : > { %s216_s16 = sadd.s32 1, %s2423_s26  ;;  %p214_p11 = scmp.eq.s32.totalorder %s213_s15, 0 }
  0x14   : > { %2936 = sst [smem:[#allocation13_spill]] %s2935_s14  ;;  %304 = sbr.rel (%p301_p10) target bundleno = 2956 (0xb8c), region = 48 }
  0x15   : > { %s2567_s17 = scalar_select %p214_p11, %s2423_s26, %s216_s16  }
  0x16   : > { %s2921_s18 = sand.u32 (!%p301_p10), 1, %s2419_s25   ;;  %p355_p12 = scmp.lt.s32.totalorder (!%p301_p10), %s2431_s28, 1 }
  0x17   : > { %2937 = sst [smem:[#allocation14_spill]] %s2567_s17  ;;  %s2573_s19 = sshll.u32 (!%p301_p10), %s2921_s18, 2 }
  0x18   : > { %p359_p13 = scmp.lt.s32.totalorder (!%p301_p10), %s2427_s27, 1  ;;  %s354_s29 = scalar_lea.vmem (!%p301_p10), [#allocation3], %s2573_s19 }
  0x19   : > { %p2063_p0 = scmp.ne.s32.totalorder (!%p301_p10), %s2427_s27, 0 }
  0x1b   : > { %s356_s20 = scalar_select %p355_p12, %s2431_s28, 1 }
  0x1c   : > { %s360_s21 = scalar_select %p359_p13, %s2427_s27, 1 }
  0x1d   : > { %s2053_s22 = sshll.u32 %s356_s20, 3  ;;  %387 = sbr.rel (%p2063_p0) target bundleno = 36 (0x24), region = 52  ;;  %vm389_vm0 = vcmask (!%p2063_p0), 261120  }
  0x1e   : > { %s358_s10 = scalar_lea.vmem %s2910_s0, %s2053_s22  ;;  %s2096_s15 = sshll.u32 %s360_s21, 4 }
  0x1f   : > { %s363_s11 = scalar_lea.vmem %s2911_s1, %s2096_s15  ;;  %s2587_s17 = scalar_lea.vmem %s2912_s2, %s2096_s15  ;;  %v388_v0 = vld [vmem:[%s358_s10] sm:$0xff] (!%p2063_p0) }
  0x20   : > { %s2592_s14 = scalar_lea.vmem %s2913_s3, %s2096_s15  ;;  %s2099_s20 = sshll.u32 %s360_s21, 6  ;;  %390 = vst.msk [vmem:[#allocation2] sm:$0xff] (!%p2063_p0), %vm389_vm0, %v388_v0 }
  0x21   : > { %s2597_s22 = scalar_lea.vmem %s2914_s4, %s2099_s20  ;;  %s2062_s23 = sshll.u32 %s360_s21, 3 }
  0x22   : > { %s2602_s16 = scalar_lea.vmem %s2915_s5, %s2062_s23 }
  0x24 PF: > { %vm393_vm1 = vcmask 261120   ;;  %v2311_v8 = vld [vmem:[%s363_s11] sm:$0xff]   ;;  %v2445_v9 = vmov 0.0   ;;  %v2312_v10 = vld [vmem:[%s363_s11 + $0x8] sm:$0xff]   ;;  %vm2446_vm2 = vmmov 0   ;;  %v408_v11 = vlaneseq  ;;  %s2447_s24 = smov 32  }
  0x25   : > { %2134 = vmatprep.subr.bf16.mxu0 %v2445_v9  ;;  %2154 = vmatprep.subr.bf16.mxu1 %v2445_v9  ;;  %v2621_v14 = vld [vmem:[%s2602_s16] sm:$0xff]  ;;  %s2448_s26 = smov 112   ;;  %s2449_s30 = smov 120   ;;  %v2453_v48 = vmov 1983009808   ;;  %vm1031_vm3 = vcmask 64512  }
  0x26   : > { %2135 = vmatpush3.bf16.msra.mxu0 %v2311_v8  ;;  %2138 = vmatprep.mubr.msk.bf16.mxu0 %vm2446_vm2, %v2445_v9  ;;  %v2616_v12 = vshrl.u32 %v408_v11, 7  ;;  %s2450_s8 = smov 104   ;;  %s2451_s11 = smov 96   ;;  %v512_v49 = vunpack.c.l.s4 %v2453_v48  ;;  %v2454_v52 = vmov 1934713408   ;;  %vm1265_vm5 = vcmask 1043456  }
  0x27   : > { %v391_v1 = vld [vmem:[#allocation2] sm:$0xff]  ;;  %2136 = vmatprep.subr.bf16.mxu0 %v2445_v9  ;;  %2156 = vmatprep.mubr.msk.bf16.mxu1 %vm2446_vm2, %v2445_v9  ;;  %s2452_s18 = smov 64   ;;  %v529_v53 = vunpack.c.l.s4 %v2454_v52  ;;  %s2457_s21 = smov 8   ;;  %vm1604_vm6 = vcmask 130048   ;;  %vm1606_vm7 = vcmask 195584  }
  0x28   : > { %v394_v2 = vsel %vm393_vm1, %v391_v1, 0.0  ;;  %v486_v13 = vsub.s32 5, %v2616_v12  ;;  %v410_v19 = vsub.s32 0, %v2616_v12  ;;  %v415_v20 = vsub.s32 1, %v2616_v12  ;;  %s2458_s10 = smov 24   ;;  %p2091_p1 = scmp.ne.s32.totalorder %s2427_s27, 1 }
  0x29   : > { %395 = vadd.xlane.f32.xlu0 %v394_v2  ;;  %v480_v28 = vsub.s32 4, %v2616_v12  ;;  %v496_v38 = vsub.s32 6, %v2616_v12  ;;  %v513_v50 = vunpack.c.0.s8 %v512_v49  ;;  %v530_v56 = vunpack.c.0.s8 %v529_v53 }
  0x2a   : > { %2137 = vmatpush3.bf16.msra.mxu0 %v2312_v10  ;;  %v487_v15 = vrot.slane %v2621_v14, %v486_v13  ;;  %v411_v21 = vrot.slane %v2621_v14, %v410_v19  ;;  %v416_v24 = vrot.slane %v2621_v14, %v415_v20  ;;  %v2455_v10 = vmov 0  }
  0x2b   : > { %2142 = vmatprep.subr.bf16.mxu0 %v2445_v9  ;;  %v481_v30 = vrot.slane %v2621_v14, %v480_v28  ;;  %v497_v40 = vrot.slane %v2621_v14, %v496_v38  ;;  %v2646_v54 = vsub.s32 %v513_v50, %v2616_v12  ;;  %v2653_v62 = vsub.s32 %v530_v56, %v2616_v12 }
  0x2c   : > { %489 = vrot.lane.b32.xlu1 %v487_v15, %s2447_s24  ;;  %vm1901_vm8 = vcmask (!%p2091_p1), 257024  }
  0x9e   : > { %v490_v29 = vpop.permute.xlu1 %489 }
  0xb6   : > { %v396_v3 = vpop.xlane.xlu0 %395 }
  0xb7   : > { %v398_v4 = vmul.f32 0.03125, %v396_v3 }
  0xb9   : > { %v399_v5 = vsub.f32 %v391_v1, %v398_v4 }
  0xbb   : > { %v400_v6 = vmul.f32 %v399_v5, %v399_v5 }
  0xbd   : > { %v401_v7 = vsel %vm393_vm1, %v400_v6, 0.0 }
  0xbe   : > { %402 = vadd.xlane.f32.xlu0 %v401_v7 }
 0x14b   : > { %v403_v16 = vpop.xlane.xlu0 %402 }
 0x14c   : > { %v404_v17 = vmul.f32 0.03125, %v403_v16 }
 0x14e   : > { %v405_v18 = vadd.f32 1e-05, %v404_v17 }
 0x150   : > { %2325 = vrsqrt.f32 %v405_v18 }
 0x15a   : > { %v2326_v22 = vpop.eup %2325 }
 0x15b   : > { %v407_v23 = vmul.f32 %v2326_v22, %v399_v5 }
 0x15d   : > { %v412_v25 = vmul.f32 %v411_v21, %v407_v23 }
 0x15f   : > { %v2632_v26 = vadd.f32 %v416_v24, %v412_v25 }
 0x161   : > { %v418_v27 = vpack.c.bf16 %v2632_v26, %v2632_v26 }
 0x163   : > { %2139 = vmatmul.mubr.msk.bf16.vlgmr.msra.gmra.mrb[0].mxu0 %vm393_vm1, %v418_v27 }
 0x164   : > { %2144 = vmatprep.mubr.msk.bf16.mxu0 %vm2446_vm2, %v2445_v9 }
 0x236   : > { %v472_v31 = vpop.f32.mrb[0].mxu0 }
 0x237   : > { %v492_v32 = vadd.f32 %v490_v29, %v472_v31  ;;  %v2140_v33 = vpop.f32.mrb[1].mxu0  ;;  %v482_v35 = vadd.f32 %v481_v30, %v472_v31 }
 0x238   : > { %v475_v34 = vpop.f32.mrb[2].mxu0 }
 0x239   : > { %v493_v36 = vpack.c.bf16 %v492_v32, %v492_v32  ;;  %v2141_v37 = vpop.f32.mrb[3].mxu0  ;;  %v483_v39 = vpack.c.bf16 %v482_v35, %v482_v35 }
 0x23b   : > { %675 = vrot.lane.b32.xlu0 %v493_v36, %s2448_s26  ;;  %673 = vrot.lane.b32.xlu1 %v493_v36, %s2449_s30  ;;  %v517_v58 = vrot.slane %v483_v39, %v2646_v54 }
 0x23f   : > { %677 = vrot.lane.b32.xlu1 %v493_v36, %s2450_s8  ;;  %507 = vrot.lane.b32.xlu0 %v483_v39, %s2448_s26 }
 0x243   : > { %679 = vrot.lane.b32.xlu1 %v493_v36, %s2451_s11  ;;  %499 = vrot.lane.b32.xlu0 %v497_v40, %s2452_s18 }
 0x2ad   : > { %v676_v41 = vpop.permute.xlu0 %675  ;;  %v674_v42 = vpop.permute.xlu1 %673 }
 0x2ae   : > { %681 = vrot.lane.b32.xlu1 %v674_v42, %s2451_s11 }
 0x2b1   : > { %v508_v43 = vpop.permute.xlu0 %507  ;;  %v678_v44 = vpop.permute.xlu1 %677 }
 0x2b2   : > { %683 = vrot.lane.b32.xlu1 %v676_v41, %s2451_s11  ;;  %v525_v57 = vrot.slane %v508_v43, %v2646_v54 }
 0x2b4   : > { %v526_v63 = vcombine.low %v517_v58, %v525_v57  ;;  %v527_v5 = vcombine.high %v517_v58, %v525_v57 }
 0x2b5   : > { %v500_v45 = vpop.permute.xlu0 %499  ;;  %v680_v51 = vpop.permute.xlu1 %679 }
 0x2b6   : > { %v502_v46 = vadd.f32 %v500_v45, %v472_v31  ;;  %685 = vrot.lane.b32.xlu1 %v678_v44, %s2451_s11  ;;  %v694_v60 = vrot.slane %v680_v51, %v2646_v54  ;;  %v2658_v6 = vrot.slane %v526_v63, %v2653_v62  ;;  %v541_v18 = vrot.slane %v527_v5, %v2653_v62 }
 0x2b8   : > { %v503_v47 = vpack.c.bf16 %v502_v46, %v502_v46  ;;  %v542_v21 = vcombine.high %v2658_v6, %v2455_v10  ;;  %v543_v51 = vcombine.high %v541_v18, %v2455_v10  ;;  %v582_v52 = vshrl.u32 %v2658_v6, 16 }
 0x2b9   : > { %v598_v56 = vshrl.u32 %v541_v18, 16 }
 0x2ba   : > { %505 = vrot.lane.b32.xlu1 %v483_v39, %s2449_s30  ;;  %852 = vrot.lane.b32.xlu0 %v503_v47, %s2448_s26 }
 0x2be   : > { %509 = vrot.lane.b32.xlu1 %v483_v39, %s2450_s8  ;;  %856 = vrot.lane.b32.xlu0 %v503_v47, %s2452_s18 }
 0x2c2   : > { %850 = vrot.lane.b32.xlu1 %v503_v47, %s2449_s30 }
 0x2c6   : > { %854 = vrot.lane.b32.xlu1 %v503_v47, %s2450_s8 }
 0x320   : > { %v682_v55 = vpop.permute.xlu1 %681 }
 0x321   : > { %v728_v7 = vrot.slane %v682_v55, %v2646_v54 }
 0x324   : > { %v684_v59 = vpop.permute.xlu1 %683 }
 0x325   : > { %v702_v61 = vrot.slane %v684_v59, %v2646_v54 }
 0x327   : > { %v703_v0 = vcombine.low %v694_v60, %v702_v61  ;;  %v704_v1 = vcombine.high %v694_v60, %v702_v61  ;;  %v590_v60 = vshrl.u32 %v542_v21, 16 }
 0x328   : > { %v686_v2 = vpop.permute.xlu1 %685 }
 0x329   : > { %v711_v3 = vrot.slane %v703_v0, %v2653_v62  ;;  %v736_v4 = vrot.slane %v686_v2, %v2646_v54  ;;  %v718_v8 = vrot.slane %v704_v1, %v2653_v62 }
 0x32b   : > { %v719_v13 = vcombine.high %v711_v3, %v2455_v10  ;;  %v737_v15 = vcombine.low %v728_v7, %v736_v4  ;;  %v738_v16 = vcombine.high %v728_v7, %v736_v4  ;;  %v720_v24 = vcombine.high %v718_v8, %v2455_v10 }
 0x32c   : > { %v506_v17 = vpop.permute.xlu1 %505  ;;  %v759_v25 = vshrl.u32 %v711_v3, 16  ;;  %v775_v28 = vshrl.u32 %v718_v8, 16 }
 0x32d   : > { %v745_v22 = vrot.slane %v737_v15, %v2653_v62  ;;  %v752_v23 = vrot.slane %v738_v16, %v2653_v62  ;;  %v767_v27 = vshrl.u32 %v719_v13, 16  ;;  %v551_v36 = vrot.slane %v506_v17, %v2646_v54 }
 0x32e   : > { %v783_v42 = vshrl.u32 %v720_v24, 16 }
 0x32f   : > { %v753_v29 = vcombine.high %v745_v22, %v2455_v10  ;;  %v754_v30 = vcombine.high %v752_v23, %v2455_v10  ;;  %v757_v31 = vpack.i.b16 %v745_v22, %v711_v3  ;;  %v760_v32 = vshrl.u32 %v745_v22, 16 }
 0x330   : > { %v510_v33 = vpop.permute.xlu1 %509  ;;  %v773_v34 = vpack.i.b16 %v752_v23, %v718_v8  ;;  %v776_v35 = vshrl.u32 %v752_v23, 16  ;;  %v606_v23 = vshrl.u32 %v543_v51, 16 }
 0x331   : > { %v559_v37 = vrot.slane %v510_v33, %v2646_v54  ;;  %v761_v38 = vpack.i.b16 %v760_v32, %v759_v25  ;;  %v765_v39 = vpack.i.b16 %v753_v29, %v719_v13  ;;  %v768_v40 = vshrl.u32 %v753_v29, 16 }
 0x332   : > { %v781_v41 = vpack.i.b16 %v754_v30, %v720_v24  ;;  %v777_v43 = vpack.i.b16 %v776_v35, %v775_v28  ;;  %v784_v44 = vshrl.u32 %v754_v30, 16  ;;  %v787_v45 = vcombine.low %v757_v31, %v773_v34 }
 0x333   : > { %v769_v46 = vpack.i.b16 %v768_v40, %v767_v27  ;;  %v560_v48 = vcombine.low %v551_v36, %v559_v37  ;;  %v561_v49 = vcombine.high %v551_v36, %v559_v37 }
 0x334   : > { %v795_v47 = vcombine.low %v765_v39, %v781_v41  ;;  %v851_v50 = vpop.permute.xlu1 %850  ;;  %v785_v53 = vpack.i.b16 %v784_v44, %v783_v42  ;;  %v812_v55 = vcombine.low %v761_v38, %v777_v43  ;;  %v794_v61 = vrot.slane %v787_v45, %v2646_v54 }
 0x335   : > { %858 = vrot.lane.b32.xlu1 %v851_v50, %s2452_s18  ;;  %v568_v57 = vrot.slane %v560_v48, %v2653_v62  ;;  %v575_v58 = vrot.slane %v561_v49, %v2653_v62 }
 0x336   : > { %v802_v59 = vrot.slane %v795_v47, %v2646_v54  ;;  %v820_v63 = vcombine.low %v769_v46, %v785_v53  ;;  %v819_v0 = vrot.slane %v812_v55, %v2646_v54 }
 0x337   : > { %v576_v1 = vcombine.high %v568_v57, %v2455_v10  ;;  %v577_v2 = vcombine.high %v575_v58, %v2455_v10  ;;  %v580_v3 = vpack.i.b16 %v568_v57, %v2658_v6  ;;  %v583_v4 = vshrl.u32 %v568_v57, 16 }
 0x338   : > { %v596_v5 = vpack.i.b16 %v575_v58, %v541_v18  ;;  %v599_v7 = vshrl.u32 %v575_v58, 16  ;;  %v803_v8 = vcombine.low %v794_v61, %v802_v59  ;;  %v827_v13 = vrot.slane %v820_v63, %v2646_v54 }
 0x339   : > { %v584_v15 = vpack.i.b16 %v583_v4, %v582_v52  ;;  %v588_v16 = vpack.i.b16 %v576_v1, %v542_v21  ;;  %v591_v17 = vshrl.u32 %v576_v1, 16  ;;  %v604_v22 = vpack.i.b16 %v577_v2, %v543_v51 }
 0x33a   : > { %v600_v24 = vpack.i.b16 %v599_v7, %v598_v56  ;;  %v607_v25 = vshrl.u32 %v577_v2, 16  ;;  %v610_v27 = vcombine.low %v580_v3, %v596_v5  ;;  %v810_v30 = vrot.slane %v803_v8, %v2653_v62 }
 0x33b   : > { %v592_v28 = vpack.i.b16 %v591_v17, %v590_v60  ;;  %v618_v29 = vcombine.low %v588_v16, %v604_v22  ;;  %v828_v31 = vcombine.low %v819_v0, %v827_v13  ;;  %v1029_v3 = vand.u32 127, %v408_v11 }
 0x33c   : > { %v608_v6 = vpack.i.b16 %v607_v25, %v606_v23  ;;  %v635_v32 = vcombine.low %v584_v15, %v600_v24  ;;  %v617_v18 = vrot.slane %v610_v27, %v2646_v54  ;;  %v811_v37 = vcombine.high %v810_v30, %v2455_v10 }
 0x33d   : > { %v625_v33 = vrot.slane %v618_v29, %v2646_v54  ;;  %v835_v34 = vrot.slane %v828_v31, %v2653_v62  ;;  %v840_v47 = vshrl.u32 %v810_v30, 16  ;;  %vm1030_vm4 = vcmp.gt.s32.totalorder %v1029_v3, %v2616_v12 }
 0x33e   : > { %v643_v21 = vcombine.low %v592_v28, %v608_v6  ;;  %v642_v39 = vrot.slane %v635_v32, %v2646_v54  ;;  %v846_v57 = vshrl.u32 %v811_v37, 16 }
 0x33f   : > { %v626_v35 = vcombine.low %v617_v18, %v625_v33  ;;  %v839_v36 = vpack.i.b16 %v835_v34, %v810_v30  ;;  %v836_v38 = vcombine.high %v835_v34, %v2455_v10  ;;  %v841_v43 = vshrl.u32 %v835_v34, 16  ;;  %v853_v18 = vpop.permute.xlu0 %852  ;;  %v855_v33 = vpop.permute.xlu1 %854 }
 0x340   : > { %v650_v40 = vrot.slane %v643_v21, %v2646_v54 }
 0x341   : > { %v1036_v41 = vsel %vm1031_vm3, %v839_v36, 0  ;;  %v845_v42 = vpack.i.b16 %v836_v38, %v811_v37  ;;  %v633_v45 = vrot.slane %v626_v35, %v2653_v62  ;;  %v842_v49 = vpack.i.b16 %v841_v43, %v840_v47 }
 0x342   : > { %v651_v44 = vcombine.low %v642_v39, %v650_v40  ;;  %2143 = vmatpush3.bf16.xpose.msra.mxu0 %v1036_v41  ;;  %v847_v55 = vshrl.u32 %v836_v38, 16 }
 0x343   : > { %v1128_v46 = vsel %vm1031_vm3, %v845_v42, 0  ;;  %2148 = vmatprep.subr.bf16.mxu0 %v2445_v9  ;;  %v634_v51 = vcombine.high %v633_v45, %v2455_v10  ;;  %v1082_v56 = vsel %vm1031_vm3, %v842_v49, 0  ;;  %v663_v59 = vshrl.u32 %v633_v45, 16  ;;  %v857_v37 = vpop.permute.xlu0 %856 }
 0x344   : > { %2155 = vmatpush3.bf16.xpose.msra.mxu1 %v1128_v46  ;;  %v658_v48 = vrot.slane %v651_v44, %v2653_v62  ;;  %v848_v60 = vpack.i.b16 %v847_v55, %v846_v57  ;;  %v871_v44 = vrot.slane %v857_v37, %v2646_v54 }
 0x345   : > { %2166 = vmatprep.subr.bf16.mxu1 %v2445_v9  ;;  %v669_v1 = vshrl.u32 %v634_v51, 16 }
 0x346   : > { %v662_v50 = vpack.i.b16 %v658_v48, %v633_v45  ;;  %v659_v52 = vcombine.high %v658_v48, %v2455_v10  ;;  %v664_v58 = vshrl.u32 %v658_v48, 16  ;;  %v1174_v63 = vsel %vm1031_vm3, %v848_v60, 0 }
 0x348   : > { %v668_v53 = vpack.i.b16 %v659_v52, %v634_v51  ;;  %v665_v61 = vpack.i.b16 %v664_v58, %v663_v59  ;;  %v670_v0 = vshrl.u32 %v659_v52, 16 }
 0x349   : > { %2145 = vmatmul.mubr.msk.bf16.vlgmr.msra.gmra.mrb[4].mxu0 %vm1031_vm3, %v662_v50 }
 0x34a   : > { %2149 = vmatpush3.bf16.xpose.msra.mxu0 %v1082_v56  ;;  %2150 = vmatprep.mubr.msk.bf16.mxu0 %vm2446_vm2, %v2445_v9  ;;  %v671_v2 = vpack.i.b16 %v670_v0, %v669_v1 }
 0x34b   : > { %2157 = vmatmul.mubr.msk.bf16.vlgmr.msra.gmra.mrb[0].mxu1 %vm1031_vm3, %v668_v53  ;;  %2160 = vmatprep.subr.bf16.mxu0 %v2445_v9 }
 0x34c   : > { %2168 = vmatprep.mubr.msk.bf16.mxu1 %vm2446_vm2, %v2445_v9 }
 0x351   : > { %2151 = vmatmul.mubr.msk.bf16.vlgmr.msra.gmra.mrb[8].mxu0 %vm1031_vm3, %v665_v61 }
 0x352   : > { %2161 = vmatpush3.bf16.xpose.msra.mxu0 %v1174_v63  ;;  %2162 = vmatprep.mubr.msk.bf16.mxu0 %vm2446_vm2, %v2445_v9 }
 0x353   : > { %2172 = vmatprep.subr.bf16.mxu0 %v2445_v9 }
 0x359   : > { %2163 = vmatmul.mubr.msk.bf16.vlgmr.msra.gmra.mrb[12].mxu0 %vm1031_vm3, %v671_v2 }
 0x35a   : > { %2174 = vmatprep.mubr.msk.bf16.mxu0 %vm2446_vm2, %v2445_v9 }
 0x3a7   : > { %v859_v41 = vpop.permute.xlu1 %858 }
 0x3a8   : > { %v905_v52 = vrot.slane %v859_v41, %v2646_v54 }
 0x41c   : > { %v1072_v4 = vpop.f32.mrb[4].mxu0 }
 0x41d   : > { %v1218_v5 = vsel %vm1030_vm4, -1e+30, %v1072_v4  ;;  %v2146_v7 = vpop.f32.mrb[5].mxu0 }
 0x41e   : > { %v1075_v8 = vpop.f32.mrb[6].mxu0  ;;  %v1164_v13 = vpop.f32.mrb[0].mxu1  ;;  %v1222_v15 = vsel %vm1031_vm3, %v1218_v5, -inf }
 0x41f   : > { %v2158_v16 = vpop.f32.mrb[1].mxu1  ;;  %1223 = vmax.xlane.f32.xlu0 %v1222_v15  ;;  %v2147_v17 = vpop.f32.mrb[7].mxu0  ;;  %v2729_v34 = vsel %vm1030_vm4, -1e+30, %v1164_v13 }
 0x420   : > { %v1167_v22 = vpop.f32.mrb[2].mxu1  ;;  %v1228_v21 = vsel %vm1031_vm3, %v2729_v34, -inf }
 0x421   : > { %v2159_v23 = vpop.f32.mrb[3].mxu1 }
 0x424   : > { %v1118_v24 = vpop.f32.mrb[8].mxu0 }
 0x425   : > { %v1219_v11 = vsel %vm1030_vm4, -1e+30, %v1118_v24  ;;  %v2152_v25 = vpop.f32.mrb[9].mxu0 }
 0x426   : > { %v1121_v27 = vpop.f32.mrb[10].mxu0  ;;  %v1225_v28 = vsel %vm1031_vm3, %v1219_v11, -inf }
 0x427   : > { %1226 = vmax.xlane.f32.xlu1 %v1225_v28  ;;  %v2153_v29 = vpop.f32.mrb[11].mxu0 }
 0x42c   : > { %v1210_v30 = vpop.f32.mrb[12].mxu0 }
 0x42d   : > { %v2164_v31 = vpop.f32.mrb[13].mxu0  ;;  %v2735_v35 = vsel %vm1030_vm4, -1e+30, %v1210_v30 }
 0x42e   : > { %v1213_v6 = vpop.f32.mrb[14].mxu0  ;;  %v1231_v36 = vsel %vm1031_vm3, %v2735_v35, -inf }
 0x42f   : > { %v2165_v32 = vpop.f32.mrb[15].mxu0 }
 0x435   : > { %860 = vrot.lane.b32.xlu0 %v853_v18, %s2452_s18 }
 0x438   : > { %862 = vrot.lane.b32.xlu1 %v855_v33, %s2452_s18 }
 0x454   : > { %1229 = vmax.xlane.f32.xlu0 %v1228_v21 }
 0x45c   : > { %1232 = vmax.xlane.f32.xlu1 %v1231_v36 }
 0x4ac   : > { %v1224_v38 = vpop.xlane.xlu0 %1223 }
 0x4ad   : > { %v1234_v39 = vsub.f32 %v1218_v5, %v1224_v38 }
 0x4af   : > { %v1238_v40 = vmul.f32 1.442695, %v1234_v39 }
 0x4b0   : > { %v861_v42 = vpop.permute.xlu0 %860 }
 0x4b1   : > { %2327 = vpow2.f32 %v1238_v40  ;;  %v879_v43 = vrot.slane %v861_v42, %v2646_v54 }
 0x4b3   : > { %v880_v45 = vcombine.low %v871_v44, %v879_v43  ;;  %v881_v48 = vcombine.high %v871_v44, %v879_v43 }
 0x4b4   : > { %v1227_v46 = vpop.xlane.xlu1 %1226 }
 0x4b5   : > { %v1235_v47 = vsub.f32 %v1219_v11, %v1227_v46  ;;  %v888_v49 = vrot.slane %v880_v45, %v2653_v62  ;;  %v895_v55 = vrot.slane %v881_v48, %v2653_v62 }
 0x4b7   : > { %v1240_v50 = vmul.f32 1.442695, %v1235_v47  ;;  %v896_v59 = vcombine.high %v888_v49, %v2455_v10  ;;  %v897_v0 = vcombine.high %v895_v55, %v2455_v10  ;;  %v936_v1 = vshrl.u32 %v888_v49, 16 }
 0x4b8   : > { %v863_v51 = vpop.permute.xlu1 %862  ;;  %v952_v8 = vshrl.u32 %v895_v55, 16 }
 0x4b9   : > { %v913_v53 = vrot.slane %v863_v51, %v2646_v54  ;;  %2329 = vpow2.f32 %v1240_v50  ;;  %v944_v7 = vshrl.u32 %v896_v59, 16  ;;  %v960_v24 = vshrl.u32 %v897_v0, 16 }
 0x4bb   : > { %v2328_v56 = vpop.eup %2327  ;;  %v914_v57 = vcombine.low %v905_v52, %v913_v53  ;;  %v915_v58 = vcombine.high %v905_v52, %v913_v53 }
 0x4bc   : > { %v1246_v60 = vsel %vm1031_vm3, %v2328_v56, 0.0  ;;  %v1258_v53 = vpack.c.bf16 %v2328_v56, %v2328_v56 }
 0x4bd   : > { %v922_v61 = vrot.slane %v914_v57, %v2653_v62  ;;  %v929_v63 = vrot.slane %v915_v58, %v2653_v62  ;;  %1247 = vadd.xlane.f32.xlu0 %v1246_v60 }
 0x4bf   : > { %v930_v2 = vcombine.high %v922_v61, %v2455_v10  ;;  %v931_v3 = vcombine.high %v929_v63, %v2455_v10  ;;  %v934_v4 = vpack.i.b16 %v922_v61, %v888_v49  ;;  %v937_v5 = vshrl.u32 %v922_v61, 16 }
 0x4c0   : > { %v950_v13 = vpack.i.b16 %v929_v63, %v895_v55  ;;  %v953_v15 = vshrl.u32 %v929_v63, 16 }
 0x4c1   : > { %v938_v16 = vpack.i.b16 %v937_v5, %v936_v1  ;;  %v942_v17 = vpack.i.b16 %v930_v2, %v896_v59  ;;  %v945_v22 = vshrl.u32 %v930_v2, 16  ;;  %v958_v23 = vpack.i.b16 %v931_v3, %v897_v0 }
 0x4c2   : > { %v954_v11 = vpack.i.b16 %v953_v15, %v952_v8  ;;  %v961_v25 = vshrl.u32 %v931_v3, 16  ;;  %v964_v27 = vcombine.low %v934_v4, %v950_v13 }
 0x4c3   : > { %v946_v28 = vpack.i.b16 %v945_v22, %v944_v7  ;;  %v972_v29 = vcombine.low %v942_v17, %v958_v23  ;;  %v2330_v30 = vpop.eup %2329 }
 0x4c4   : > { %v962_v31 = vpack.i.b16 %v961_v25, %v960_v24  ;;  %v989_v6 = vcombine.low %v938_v16, %v954_v11  ;;  %v971_v32 = vrot.slane %v964_v27, %v2646_v54  ;;  %v1249_v18 = vsel %vm1031_vm3, %v2330_v30, 0.0 }
 0x4c5   : > { %v979_v33 = vrot.slane %v972_v29, %v2646_v54  ;;  %1250 = vadd.xlane.f32.xlu0 %v1249_v18  ;;  %v1259_v58 = vpack.c.bf16 %v2330_v30, %v2330_v30 }
 0x4c6   : > { %v997_v21 = vcombine.low %v946_v28, %v962_v31  ;;  %v996_v37 = vrot.slane %v989_v6, %v2646_v54 }
 0x4c7   : > { %v980_v36 = vcombine.low %v971_v32, %v979_v33 }
 0x4c8   : > { %v1004_v38 = vrot.slane %v997_v21, %v2646_v54 }
 0x4c9   : > { %v987_v39 = vrot.slane %v980_v36, %v2653_v62 }
 0x4ca   : > { %v1005_v40 = vcombine.low %v996_v37, %v1004_v38 }
 0x4cb   : > { %v988_v41 = vcombine.high %v987_v39, %v2455_v10  ;;  %v1017_v44 = vshrl.u32 %v987_v39, 16 }
 0x4cc   : > { %v1012_v42 = vrot.slane %v1005_v40, %v2653_v62 }
 0x4cd   : > { %v1023_v47 = vshrl.u32 %v988_v41, 16 }
 0x4ce   : > { %v1016_v43 = vpack.i.b16 %v1012_v42, %v987_v39  ;;  %v1018_v45 = vshrl.u32 %v1012_v42, 16  ;;  %v1013_v46 = vcombine.high %v1012_v42, %v2455_v10 }
 0x4d0   : > { %v1267_v48 = vsel %vm1265_vm5, %v1016_v43, 0  ;;  %v1019_v49 = vpack.i.b16 %v1018_v45, %v1017_v44  ;;  %v1022_v50 = vpack.i.b16 %v1013_v46, %v988_v41  ;;  %v1024_v51 = vshrl.u32 %v1013_v46, 16 }
 0x4d1   : > { %2167 = vmatpush3.bf16.msra.mxu1 %v1267_v48 }
 0x4d2   : > { %v1313_v52 = vsel %vm1265_vm5, %v1019_v49, 0  ;;  %2178 = vmatprep.subr.bf16.mxu1 %v2445_v9  ;;  %v1025_v55 = vpack.i.b16 %v1024_v51, %v1023_v47  ;;  %v1359_v57 = vsel %vm1265_vm5, %v1022_v50, 0 }
 0x4d3   : > { %2173 = vmatpush3.bf16.msra.mxu0 %v1313_v52 }
 0x4d4   : > { %2169 = vmatmul.mubr.msk.bf16.vlgmr.msra.gmra.mrb[4].mxu1 %vm1031_vm3, %v1258_v53  ;;  %2184 = vmatprep.subr.bf16.mxu0 %v2445_v9  ;;  %v1405_v10 = vsel %vm1265_vm5, %v1025_v55, 0  ;;  %v2313_v55 = vld [vmem:[%s2587_s17] sm:$0xff]  }
 0x4d5   : > { %2179 = vmatpush3.bf16.msra.mxu1 %v1359_v57  ;;  %2180 = vmatprep.mubr.msk.bf16.mxu1 %vm2446_vm2, %v2445_v9 }
 0x4d6   : > { %2175 = vmatmul.mubr.msk.bf16.vlgmr.msra.gmra.mrb[16].mxu0 %vm1031_vm3, %v1259_v58  ;;  %2190 = vmatprep.subr.bf16.mxu1 %v2445_v9 }
 0x4d7   : > { %2185 = vmatpush3.bf16.msra.mxu0 %v1405_v10  ;;  %2186 = vmatprep.mubr.msk.bf16.mxu0 %vm2446_vm2, %v2445_v9 }
 0x4d8   : > { %2198 = vmatprep.subr.bf16.mxu0 %v2445_v9 }
 0x4e1   : > { %v1230_v56 = vpop.xlane.xlu0 %1229 }
 0x4e2   : > { %v1236_v59 = vsub.f32 %v2729_v34, %v1230_v56 }
 0x4e4   : > { %v1242_v60 = vmul.f32 1.442695, %v1236_v59 }
 0x4e6   : > { %2331 = vpow2.f32 %v1242_v60 }
 0x4e9   : > { %v1233_v61 = vpop.xlane.xlu1 %1232 }
 0x4ea   : > { %v1237_v63 = vsub.f32 %v2735_v35, %v1233_v61 }
 0x4ec   : > { %v1244_v0 = vmul.f32 1.442695, %v1237_v63 }
 0x4ee   : > { %2333 = vpow2.f32 %v1244_v0  ;;  %v2314_v0 = vld [vmem:[%s2587_s17 + $0x8] sm:$0xff]   ;;  %s2456_s17 = smov 16  }
 0x4f0   : > { %v2332_v1 = vpop.eup %2331 }
 0x4f1   : > { %v1252_v2 = vsel %vm1031_vm3, %v2332_v1, 0.0  ;;  %v1260_v3 = vpack.c.bf16 %v2332_v1, %v2332_v1 }
 0x4f2   : > { %1253 = vadd.xlane.f32.xlu1 %v1252_v2 }
 0x4f3   : > { %2181 = vmatmul.mubr.msk.bf16.vlgmr.msra.gmra.mrb[8].mxu1 %vm1031_vm3, %v1260_v3 }
 0x4f4   : > { %2194 = vmatprep.mubr.msk.bf16.mxu1 %vm2446_vm2, %v2445_v9  ;;  %2191 = vmatpush3.bf16.msra.mxu1 %v2313_v55 }
 0x4f5   : > { %2192 = vmatprep.subr.bf16.mxu1 %v2445_v9 }
 0x4f8   : > { %v2334_v4 = vpop.eup %2333  ;;  %2193 = vmatpush3.bf16.msra.mxu1 %v2314_v0 }
 0x4f9   : > { %v1255_v34 = vsel %vm1031_vm3, %v2334_v4, 0.0  ;;  %v1261_v5 = vpack.c.bf16 %v2334_v4, %v2334_v4  ;;  %2206 = vmatprep.subr.bf16.mxu1 %v2445_v9 }
 0x4fa   : > { %1256 = vadd.xlane.f32.xlu0 %v1255_v34 }
 0x4fb   : > { %2187 = vmatmul.mubr.msk.bf16.vlgmr.msra.gmra.mrb[20].mxu0 %vm1031_vm3, %v1261_v5 }
 0x4fc   : > { %2202 = vmatprep.mubr.msk.bf16.mxu0 %vm2446_vm2, %v2445_v9 }
 0x54a   : > { %v1248_v23 = vpop.xlane.xlu0 %1247 }
 0x54b   : > { %2335 = vrcp.f32 %v1248_v23 }
 0x552   : > { %v1251_v11 = vpop.xlane.xlu0 %1250 }
 0x555   : > { %v2336_v27 = vpop.eup %2335 }
 0x57f   : > { %v1254_v24 = vpop.xlane.xlu1 %1253 }
 0x580   : > { %2337 = vrcp.f32 %v1254_v24 }
 0x581   : > { %2339 = vrcp.f32 %v1251_v11 }
 0x587   : > { %v1257_v25 = vpop.xlane.xlu0 %1256 }
 0x588   : > { %2341 = vrcp.f32 %v1257_v25 }
 0x58a   : > { %v2338_v28 = vpop.eup %2337 }
 0x58b   : > { %v2340_v36 = vpop.eup %2339 }
 0x592   : > { %v2342_v37 = vpop.eup %2341 }
 0x5a7   : > { %v1303_v35 = vpop.f32.mrb[4].mxu1 }
 0x5a8   : > { %v2170_v7 = vpop.f32.mrb[5].mxu1  ;;  %v1451_v30 = vmul.f32 %v2336_v27, %v1303_v35 }
 0x5a9   : > { %v1306_v8 = vpop.f32.mrb[6].mxu1  ;;  %v1349_v13 = vpop.f32.mrb[16].mxu0 }
 0x5aa   : > { %v2171_v15 = vpop.f32.mrb[7].mxu1  ;;  %v2176_v16 = vpop.f32.mrb[17].mxu0  ;;  %v1452_v39 = vmul.f32 %v2340_v36, %v1349_v13 }
 0x5ab   : > { %v1352_v17 = vpop.f32.mrb[18].mxu0 }
 0x5ac   : > { %v2177_v22 = vpop.f32.mrb[19].mxu0 }
 0x5c6   : > { %v1395_v29 = vpop.f32.mrb[8].mxu1 }
 0x5c7   : > { %v1453_v31 = vmul.f32 %v2338_v28, %v1395_v29  ;;  %v2182_v6 = vpop.f32.mrb[9].mxu1 }
 0x5c8   : > { %v1398_v32 = vpop.f32.mrb[10].mxu1 }
 0x5c9   : > { %v1455_v18 = vcombine.low %v1451_v30, %v1453_v31  ;;  %v1456_v33 = vcombine.high %v1451_v30, %v1453_v31  ;;  %v2183_v21 = vpop.f32.mrb[11].mxu1  ;;  %v1615_v30 = vsub.s32 7, %v2616_v12 }
 0x5cb   : > { %v1463_v46 = vrot.slane %v1455_v18, %v2646_v54  ;;  %v1470_v47 = vrot.slane %v1456_v33, %v2646_v54  ;;  %v1616_v31 = vrot.slane %v2621_v14, %v1615_v30 }
 0x5ce   : > { %v1441_v38 = vpop.f32.mrb[20].mxu0 }
 0x5cf   : > { %v1454_v40 = vmul.f32 %v2342_v37, %v1441_v38  ;;  %v2188_v41 = vpop.f32.mrb[21].mxu0 }
 0x5d0   : > { %v1444_v42 = vpop.f32.mrb[22].mxu0 }
 0x5d1   : > { %v1471_v43 = vcombine.low %v1452_v39, %v1454_v40  ;;  %v1472_v44 = vcombine.high %v1452_v39, %v1454_v40  ;;  %v2189_v45 = vpop.f32.mrb[23].mxu0 }
 0x5d3   : > { %v1479_v48 = vrot.slane %v1471_v43, %v2646_v54  ;;  %v1486_v49 = vrot.slane %v1472_v44, %v2646_v54  ;;  %v2315_v43 = vld [vmem:[%s2592_s14] sm:$0xff]   ;;  %v2316_v44 = vld [vmem:[%s2592_s14 + $0x8] sm:$0xff]  }
 0x5d4   : > { %2199 = vmatpush3.bf16.msra.mxu0 %v2315_v43 }
 0x5d5   : > { %v1487_v50 = vcombine.low %v1463_v46, %v1479_v48  ;;  %v1488_v51 = vcombine.high %v1463_v46, %v1479_v48  ;;  %v1503_v52 = vcombine.low %v1470_v47, %v1486_v49  ;;  %v1504_v53 = vcombine.high %v1470_v47, %v1486_v49  ;;  %2200 = vmatprep.subr.bf16.mxu0 %v2445_v9 }
 0x5d6   : > { %v1688_v48 = vsub.s32 2, %v2616_v12  ;;  %v1693_v49 = vsub.s32 3, %v2616_v12 }
 0x5d7   : > { %v1495_v57 = vrot.slane %v1487_v50, %v2653_v62  ;;  %v1502_v58 = vrot.slane %v1488_v51, %v2653_v62  ;;  %v1511_v10 = vrot.slane %v1503_v52, %v2653_v62  ;;  %v1518_v56 = vrot.slane %v1504_v53, %v2653_v62 }
 0x5d8   : > { %2201 = vmatpush3.bf16.msra.mxu0 %v2316_v44  ;;  %v1689_v50 = vrot.slane %v2621_v14, %v1688_v48  ;;  %v1694_v53 = vrot.slane %v2621_v14, %v1693_v49  ;;  %v2321_v14 = vld [vmem:[%s2597_s22 + $0x20] sm:$0xff]  }
 0x5d9   : > { %v1523_v59 = vcombine.low %v1495_v57, %v1502_v58  ;;  %v2075_v60 = vcombine.high %v1495_v57, %v1502_v58  ;;  %v1539_v61 = vcombine.low %v1511_v10, %v1518_v56  ;;  %v2076_v63 = vcombine.high %v1511_v10, %v1518_v56  ;;  %v2318_v10 = vld [vmem:[%s2597_s22 + $0x8] sm:$0xff]   ;;  %v2319_v56 = vld [vmem:[%s2597_s22 + $0x10] sm:$0xff]  }
 0x5db   : > { %v1530_v1 = vrot.slane %v1523_v59, %v2646_v54  ;;  %v1538_v2 = vrot.slane %v2075_v60, %v2646_v54  ;;  %v1546_v3 = vrot.slane %v1539_v61, %v2646_v54  ;;  %v1554_v4 = vrot.slane %v2076_v63, %v2646_v54  ;;  %v2320_v59 = vld [vmem:[%s2597_s22 + $0x18] sm:$0xff]   ;;  %v2322_v60 = vld [vmem:[%s2597_s22 + $0x28] sm:$0xff]   ;;  %v2323_v61 = vld [vmem:[%s2597_s22 + $0x30] sm:$0xff]  }
 0x5dc   : > { %v2324_v63 = vld [vmem:[%s2597_s22 + $0x38] sm:$0xff]  }
 0x5dd   : > { %v1556_v34 = vcombine.high %v1530_v1, %v1538_v2  ;;  %v1572_v5 = vcombine.high %v1546_v3, %v1554_v4  ;;  %v1555_v35 = vcombine.low %v1530_v1, %v1538_v2  ;;  %v1571_v7 = vcombine.low %v1546_v3, %v1554_v4 }
 0x5df   : > { %v1570_v8 = vrot.slane %v1556_v34, %v2653_v62  ;;  %v1586_v13 = vrot.slane %v1572_v5, %v2653_v62  ;;  %v1563_v15 = vrot.slane %v1555_v35, %v2653_v62  ;;  %v1579_v16 = vrot.slane %v1571_v7, %v2653_v62 }
 0x5e1   : > { %v1589_v17 = vcombine.low %v1570_v8, %v1586_v13  ;;  %v1588_v22 = vcombine.high %v1563_v15, %v1579_v16  ;;  %v1590_v23 = vcombine.high %v1570_v8, %v1586_v13  ;;  %v1587_v24 = vcombine.low %v1563_v15, %v1579_v16 }
 0x5e3   : > { %1596 = vrot.lane.b32.xlu0 %v1589_v17, %s2456_s17  ;;  %1592 = vrot.lane.b32.xlu1 %v1588_v22, %s2457_s21 }
 0x5e7   : > { %1600 = vrot.lane.b32.xlu1 %v1590_v23, %s2458_s10 }
 0x655   : > { %v1593_v54 = vpop.permute.xlu1 %1592  ;;  %v1597_v11 = vpop.permute.xlu0 %1596 }
 0x656   : > { %v1603_v25 = vsel %vm1031_vm3, %v1587_v24, %v1593_v54 }
 0x657   : > { %v1605_v28 = vsel %vm1604_vm6, %v1603_v25, %v1597_v11 }
 0x659   : > { %v1601_v27 = vpop.permute.xlu1 %1600 }
 0x65a   : > { %v1607_v29 = vsel %vm1606_vm7, %v1605_v28, %v1601_v27 }
 0x65b   : > { %v1608_v62 = vpack.c.bf16 %v1607_v29, %v1607_v29 }
 0x65d   : > { %2195 = vmatmul.mubr.msk.bf16.vlgmr.msra.gmra.mrb[12].mxu1 %vm393_vm1, %v1608_v62 }
 0x65e   : > { %2222 = vmatprep.mubr.msk.bf16.mxu1 %vm2446_vm2, %v2445_v9 }
 0x730   : > { %v1666_v6 = vpop.f32.mrb[12].mxu1 }
 0x731   : > { %v1667_v32 = vadd.f32 %v1666_v6, %v1616_v31  ;;  %v2196_v18 = vpop.f32.mrb[13].mxu1 }
 0x732   : > { %v1669_v33 = vpop.f32.mrb[14].mxu1 }
 0x733   : > { %v2812_v21 = vadd.f32 %v1667_v32, %v2632_v26  ;;  %v2197_v36 = vpop.f32.mrb[15].mxu1  ;;  %v2317_v26 = vld [vmem:[%s2597_s22] sm:$0xff]  }
 0x734   : > { %2207 = vmatpush3.bf16.msra.mxu1 %v2317_v26  ;;  %v1876_v32 = vld [vmem:[%s2916_s6] sm:$0x3] (!%p2091_p1) }
 0x735   : > { %v1673_v37 = vsel %vm393_vm1, %v2812_v21, 0.0  ;;  %2208 = vmatprep.subr.bf16.mxu1 %v2445_v9  ;;  %v1893_v18 = vrot.slane (!%p2091_p1), %v1876_v32, %v410_v19  ;;  %v1898_v36 = vrot.slane (!%p2091_p1), %v1876_v32, %v415_v20 }
 0x736   : > { %1674 = vadd.xlane.f32.xlu1 %v1673_v37 }
 0x738   : > { %2209 = vmatpush3.bf16.msra.mxu1 %v2318_v10 }
 0x739   : > { %2210 = vmatprep.subr.bf16.mxu1 %v2445_v9 }
 0x73c   : > { %2211 = vmatpush3.bf16.msra.mxu1 %v2319_v56 }
 0x73d   : > { %2212 = vmatprep.subr.bf16.mxu1 %v2445_v9 }
 0x740   : > { %2213 = vmatpush3.bf16.msra.mxu1 %v2320_v59 }
 0x741   : > { %2214 = vmatprep.subr.bf16.mxu1 %v2445_v9 }
 0x744   : > { %2215 = vmatpush3.bf16.msra.mxu1 %v2321_v14 }
 0x745   : > { %2216 = vmatprep.subr.bf16.mxu1 %v2445_v9 }
 0x748   : > { %2217 = vmatpush3.bf16.msra.mxu1 %v2322_v60 }
 0x749   : > { %2218 = vmatprep.subr.bf16.mxu1 %v2445_v9 }
 0x74c   : > { %2219 = vmatpush3.bf16.msra.mxu1 %v2323_v61 }
 0x74d   : > { %2220 = vmatprep.subr.bf16.mxu1 %v2445_v9 }
 0x750   : > { %2221 = vmatpush3.bf16.msra.mxu1 %v2324_v63 }
 0x7c3   : > { %v1675_v38 = vpop.xlane.xlu1 %1674 }
 0x7c4   : > { %v1676_v39 = vmul.f32 0.03125, %v1675_v38 }
 0x7c6   : > { %v1677_v40 = vsub.f32 %v2812_v21, %v1676_v39 }
 0x7c8   : > { %v1678_v41 = vmul.f32 %v1677_v40, %v1677_v40 }
 0x7ca   : > { %v1679_v42 = vsel %vm393_vm1, %v1678_v41, 0.0 }
 0x7cb   : > { %1680 = vadd.xlane.f32.xlu0 %v1679_v42 }
 0x858   : > { %v1681_v45 = vpop.xlane.xlu0 %1680 }
 0x859   : > { %v1682_v46 = vmul.f32 0.03125, %v1681_v45 }
 0x85b   : > { %v1683_v47 = vadd.f32 1e-05, %v1682_v46 }
 0x85d   : > { %2343 = vrsqrt.f32 %v1683_v47 }
 0x867   : > { %v2344_v51 = vpop.eup %2343 }
 0x868   : > { %v1685_v52 = vmul.f32 %v2344_v51, %v1677_v40 }
 0x86a   : > { %v1690_v55 = vmul.f32 %v1689_v50, %v1685_v52 }
 0x86c   : > { %v1695_v57 = vadd.f32 %v1694_v53, %v1690_v55 }
 0x86e   : > { %v1696_v58 = vpack.c.bf16 %v1695_v57, %v1695_v57 }
 0x870   : > { %2203 = vmatmul.mubr.msk.bf16.vlgmr.msra.gmra.mrb[24].mxu0 %vm393_vm1, %v1696_v58 }
 0x943   : > { %v1750_v0 = vpop.f32.mrb[24].mxu0 }
 0x944   : > { %v1756_v1 = vmul.f32 %v1750_v0, %v1750_v0  ;;  %v2204_v2 = vpop.f32.mrb[25].mxu0 }
 0x945   : > { %v1753_v3 = vpop.f32.mrb[26].mxu0 }
 0x946   : > { %v1757_v4 = vmul.f32 %v1756_v1, %v1750_v0  ;;  %v2205_v34 = vpop.f32.mrb[27].mxu0 }
 0x948   : > { %v1758_v5 = vmul.f32 0.044715, %v1757_v4 }
 0x94a   : > { %v1759_v35 = vadd.f32 %v1758_v5, %v1750_v0 }
 0x94c   : > { %v1760_v7 = vmul.f32 0.7978846, %v1759_v35 }
 0x94e   : > { %2345 = vtanh.f32 %v1760_v7 }
 0x958   : > { %v2346_v8 = vpop.eup %2345 }
 0x959   : > { %v1762_v13 = vadd.f32 1.0, %v2346_v8 }
 0x95b   : > { %v1763_v15 = vmul.f32 0.5, %v1762_v13 }
 0x95d   : > { %v1764_v16 = vmul.f32 %v1763_v15, %v1750_v0 }
 0x95f   : > { %v1765_v17 = vpack.c.bf16 %v1764_v16, %v1764_v16 }
 0x961   : > { %2223 = vmatmul.mubr.bf16.vlgmr.msra.gmra.mrb[16].mxu1 %v1765_v17 }
 0xa31   : > { %1875 = sbr.rel (%p2091_p1) target bundleno = 2931 (0xb73), region = 56 }
 0xa34   : > { %v1864_v22 = vpop.f32.mrb[16].mxu1 }
 0xa35   : > { %v1870_v9 = vadd.f32 %v1864_v22, %v2812_v21  ;;  %v2224_v23 = vpop.f32.mrb[17].mxu1 }
 0xa36   : > { %v1867_v24 = vpop.f32.mrb[18].mxu1 }
 0xa37   : > { %1871 = vst.msk [vmem:[#allocation2] sm:$0xff] %vm393_vm1, %v1870_v9  ;;  %v2225_v54 = vpop.f32.mrb[19].mxu1  ;;  %v1877_v11 = vsel (!%p2091_p1), %vm393_vm1, %v1870_v9, 0.0 }
 0xa38   : > { %1878 = vadd.xlane.f32.xlu0 %v1877_v11 }
 0xac5   : > { %v1879_v25 = vpop.xlane.xlu0 %1878 }
 0xac6   : > { %v1880_v27 = vmul.f32 0.03125, %v1879_v25 }
 0xac8   : > { %v1881_v28 = vsub.f32 %v1870_v9, %v1880_v27 }
 0xaca   : > { %v1882_v29 = vmul.f32 %v1881_v28, %v1881_v28 }
 0xacc   : > { %v1883_v62 = vsel %vm393_vm1, %v1882_v29, 0.0 }
 0xacd   : > { %1884 = vadd.xlane.f32.xlu0 %v1883_v62 }
 0xb5a   : > { %v1885_v30 = vpop.xlane.xlu0 %1884 }
 0xb5b   : > { %v1886_v31 = vmul.f32 0.03125, %v1885_v30 }
 0xb5d   : > { %v1887_v6 = vadd.f32 1e-05, %v1886_v31 }
 0xb5f   : > { %2347 = vrsqrt.f32 %v1887_v6 }
 0xb69   : > { %v2348_v33 = vpop.eup %2347 }
 0xb6a   : > { %v1889_v21 = vmul.f32 %v2348_v33, %v1881_v28 }
 0xb6c   : > { %v1894_v37 = vmul.f32 %v1893_v18, %v1889_v21 }
 0xb6e   : > { %v1899_v38 = vadd.f32 %v1898_v36, %v1894_v37 }
 0xb70   : > { %v1900_v39 = vpack.c.bf16 %v1899_v38, %v1899_v38 }
 0xb72   : > { %1902 = vst.msk [vmem:[%s354_s29] sm:$0xf] %vm1901_vm8, %v1900_v39 }
 0xb73 PF: > { %s2093_s27 = sshll.u32 %s2431_s28, 6  ;;  %s1917_s9 = sshll.u32 %s354_s29, 4  ;;  %s1918_s9 = int_to_ptr.vmem [resolvable:$true] %s1917_s9 }
 0xb74   : > { %s2859_s23 = scalar_lea.hbm %s2917_s7, %s2093_s27  ;;  %s2938_s12 = sand.u32 1, %s2419_s25  }
 0xb75   : > { %s1904_s16 = scalar_lea.sflag [#allocation4], %s2938_s12  ;;  %s2349_s24 = scalar_lea.vmem %s1918_s9, 64 }
 0xb76   : > { %p2350_p2 = scmp.ne.s32.totalorder %s1918_s9, %s2349_s24  ;;  %s2459_s26 = smov [#allocation3]  }
 0xb77   : > { %s2353_s30 = sshll.u32 %s2459_s26, 4  ;;  %s2354_s30 = int_to_ptr.vmem [resolvable:$false] %s2353_s30 }
 0xb78   : > { %p2351_p4 = pnand %p2350_p2, %p2549_p3  ;;  %s2355_s8 = scalar_lea.vmem %s2354_s30, 128 }
 0xb79   : > { %p2356_p6 = scmp.lt.s32.totalorder %s1918_s9, %s2354_s30  ;;  %p2357_p7 = scmp.lt.s32.totalorder %s2355_s8, %s2349_s24 }
 0xb7a   : > { %p2352_p5 = pneg %p2351_p4 }
 0xb7b   : > { %p2358_p8 = por %p2357_p7, %p2356_p6 }
 0xb7d   : > { %p2359_p10 = pnand %p2358_p8, %p2352_p5 }
 0xb7f   : > { %2362 = shalt.err (!%p2359_p10)
}
 0xb80   : > { %s2363_s28 = scalar_lea.hbm %s2859_s23, 64  ;;  %s2367_s11 = scalar_lea.hbm %s2917_s7, 128 }
 0xb81   : > { %p2364_p11 = scmp.ne.s32.totalorder %s2859_s23, %s2363_s28  ;;  %p2368_p0 = scmp.lt.u32.totalorder %s2859_s23, %s2917_s7 }
 0xb82   : > { %p2369_p1 = scmp.lt.u32.totalorder %s2367_s11, %s2363_s28  ;;  %p2371_p4 = scmp.lt.u32.totalorder %s2363_s28, %s2859_s23 }
 0xb83   : > { %p2365_p12 = pnand %p2364_p11, %p2549_p3 }
 0xb84   : > { %p2370_p2 = por %p2369_p1, %p2368_p0 }
 0xb85   : > { %p2366_p13 = pneg %p2365_p12 }
 0xb86   : > { %p2372_p5 = por %p2371_p4, %p2370_p2 }
 0xb88   : > { %p2373_p6 = pnand %p2372_p5, %p2366_p13 }
 0xb8a   : > { %2376 = shalt.err (!%p2373_p6)
}
 0xb8b   : > { %2226 = dma.vmem_to_hbm [thread:$0]  (%p2549_p3), %s1918_s9, 64, %s2859_s23, %s1904_s16  }
 0xb8c PF: > { %s2939_s21 = sld [smem:[#allocation10_spill]]  ;;  %s2940_s10 = sld [smem:[#allocation6_spill]] }
 0xb92   : > { %p2232_p7 = scmp.ge.s32.totalorder %s2939_s21, 2  ;;  %s1929_s15 = sand.u32 1, %s2940_s10  }
 0xb93   : > { %s1930_s27 = scalar_lea.sflag [#allocation4], %s1929_s15 }
 0xb94   : > { %p2229_p8 = pnand %p2232_p7, %p2559_p9 }
 0xb96   : > { %2410 = dma.done.wait (!%p2229_p8), %s1930_s27, 64  }
 0xb97   : > { %2412 = vsyncadd (!%p2229_p8), %s1930_s27, 4294967232  ;;  %s20_s8 = sadd.s32 1, %s2939_s21   ;;  %s2942_s20 = sld [smem:[#allocation7_spill]] }
 0xb98   : > { %p17_p10 = scmp.ge.s32.totalorder %s20_s8, 6   ;;  %s2943_s26 = sld [smem:[#allocation14_spill]] }
 0xb99   : > { %s2944_s27 = sld [smem:[#allocation8_spill]]  ;;  %s2945_s28 = sld [smem:[#allocation9_spill]] }
 0xb9a   : > { %s2946_s29 = sld [smem:[#allocation11_spill]]  ;;  %s2947_s30 = sld [smem:[#allocation12_spill]] }
 0xb9b   : > { %s2948_s24 = smov %s2419_s25  ;;  %19 = sbr.rel (!%p17_p10) target bundleno = 5 (0x5), region = 106 }
 0xb9d   : > { %s2949_s25 = smov %s2942_s20 }
 0xba2   :  { %1935 = vsyncpa [#allocation4], 1 }
 0xba3   :  { %1937 = vsyncpa [#allocation4 + $0x1], 1 }

</bundles_post_ra>
